<compile_context>
chip_gen: v5e
topology: v5e:2x2
jax: 0.10.0
libtpu: 0.0.40
codegen_flags: <defaults>
</compile_context>

<pallas_src>
import jax
import jax.numpy as jnp
import numpy as np
from jax.experimental import pallas as pl
from jax.experimental.pallas import tpu as pltpu


def _round_up(x, m):
    return -(-x // m) * m


def span_v2_kernel(ht_ref, spans_ref, w1s_ref, w1e_ref, wm_ref, b1_ref,
                   w2_ref, b2_ref, o_ref, g_ref):
    nt = pl.program_id(1)
    cdt = g_ref.dtype                        # compute dtype (bf16 or f32)
    S = ht_ref.shape[2]
    TN = spans_ref.shape[2]
    WMAX = wm_ref.shape[1]
    K = g_ref.shape[1]
    SP = _round_up(S, 128)                   # lane-aligned section offsets
    OFF_E, OFF_W = SP, 2 * SP

    # Once per batch (first span tile): fill the stacked scratch
    #   G^T = [ (h@W1_start)^T | (h@W1_end)^T | (width_emb@W1_width)^T ]
    @pl.when(nt == 0)
    def _():
        g_ref[...] = jnp.zeros_like(g_ref)   # zero padding columns (no NaN*0)
        h_t = ht_ref[0].astype(cdt)          # (H, S)
        g_ref[:, 0:S] = jnp.dot(
            w1s_ref[...], h_t, preferred_element_type=jnp.float32).astype(cdt)
        g_ref[:, OFF_E:OFF_E + S] = jnp.dot(
            w1e_ref[...], h_t, preferred_element_type=jnp.float32).astype(cdt)
        g_ref[:, OFF_W:OFF_W + WMAX] = wm_ref[...]

    spans_t = spans_ref[0]                   # (3, TN) int32
    starts = spans_t[0:1, :]                 # (1, TN)
    ends = spans_t[1:2, :] + OFF_E
    widths = spans_t[2:3, :] + OFF_W

    # Combined one-hot over the stacked contraction axis -> ONE gather matmul.
    # Sections are disjoint, so the OR is an exact sum of three one-hots.
    iota_k = jax.lax.broadcasted_iota(jnp.int32, (K, TN), 0)
    oh_t = ((iota_k == starts) | (iota_k == ends) |
            (iota_k == widths)).astype(cdt)  # (K, TN)

    pre_t = jnp.dot(g_ref[...], oh_t,
                    preferred_element_type=jnp.float32) + b1_ref[...]  # (H, TN)
    hid_t = jnp.maximum(pre_t, 0.0).astype(cdt)
    logits_t = jnp.dot(w2_ref[...], hid_t,
                       preferred_element_type=jnp.float32) + b2_ref[...]  # (L8, TN)
    o_ref[0] = logits_t.astype(o_ref.dtype)


def span_v2_forward(hidden_states, spans, params, *, span_tile=256,
                    compute_dtype=jnp.bfloat16):
    """hidden_states: (B,S,H) f32; spans: (B,N,3) int -> logits (B,N,L) f32."""
    B, S, H = hidden_states.shape
    N = spans.shape[1]
    wt = params["width_embedding"].astype(jnp.float32)   # (WMAX, Wd)
    W1 = params["w1"].astype(jnp.float32)                # (2H+Wd, H)  (in, out)
    b1 = params["b1"].astype(jnp.float32)
    W2 = params["w2"].astype(jnp.float32)                # (H, L)      (in, out)
    b2 = params["b2"].astype(jnp.float32)
    WMAX = wt.shape[0]
    L = W2.shape[1]
    L8 = _round_up(L, 8)

    # ---- span-axis tiling: multiple of 128 when tiled, else full (mult of 8) -
    if N > span_tile:
        TN = max(128, (span_tile // 128) * 128)
    else:
        TN = _round_up(N, 8)
    NP = _round_up(N, TN)
    NT = NP // TN

    spans_i = spans.astype(jnp.int32)
    if NP != N:
        spans_i = jnp.concatenate(
            [spans_i, jnp.zeros((B, NP - N, 3), jnp.int32)], axis=1)
    spans_t = jnp.transpose(spans_i, (0, 2, 1))          # (B, 3, NP)

    # ---- transposed layouts (features, items); fold the width path ----------
    ht = jnp.transpose(hidden_states, (0, 2, 1)).astype(compute_dtype)  # (B,H,S)
    w1s_t = W1[:H].T.astype(compute_dtype)                              # (H, H)
    w1e_t = W1[H:2 * H].T.astype(compute_dtype)                         # (H, H)
    wm_t = jnp.dot(wt, W1[2 * H:], preferred_element_type=jnp.float32,
                   precision=jax.lax.Precision.HIGHEST).T.astype(compute_dtype)
    b1_t = b1.reshape(H, 1)                                             # f32
    w2_t = jnp.zeros((L8, H), jnp.float32).at[:L].set(W2.T).astype(compute_dtype)
    b2_t = jnp.zeros((L8, 1), jnp.float32).at[:L, 0].set(b2)

    # Stacked contraction axis: [start | end | width], lane-aligned sections.
    SP = _round_up(S, 128)
    K = _round_up(2 * SP + WMAX, 128)

    cd = jnp.dtype(compute_dtype).itemsize

    def build(single_buffer_weights):
        kw = {"pipeline_mode": pl.Buffered(1)} if single_buffer_weights else {}
        wbuf = 1 if single_buffer_weights else 2
        # Generation-aware VMEM budget: resident blocks x buffers + scratch +
        # per-tile temporaries, capped at 75% of physical VMEM.
        need = (2 * H * S * cd                       # hidden^T block (dbl buf)
                + 2 * 3 * TN * 4                     # spans block
                + wbuf * (2 * H * H * cd + H * WMAX * cd + H * 4
                          + L8 * H * cd + L8 * 4)    # weights / biases
                + 2 * L8 * TN * 4                    # output block
                + H * K * cd                         # stacked scratch
                + K * TN * cd + 2 * H * TN * 4 + L8 * TN * 4)  # kernel temps
        try:
            phys = pltpu.get_tpu_info().vmem_capacity_bytes
        except Exception:
            phys = 64 * 1024 * 1024                  # conservative (v7x)
        vmem_limit = int(min(max(int(need * 1.3) + (4 << 20), 32 << 20),
                             int(phys) * 3 // 4))

        return pl.pallas_call(
            span_v2_kernel,
            out_shape=jax.ShapeDtypeStruct((B, L8, NP), jnp.float32),
            grid_spec=pltpu.PrefetchScalarGridSpec(
                num_scalar_prefetch=0,
                grid=(B, NT),
                in_specs=[
                    pl.BlockSpec((1, H, S), lambda b, n: (b, 0, 0)),     # hidden^T
                    pl.BlockSpec((1, 3, TN), lambda b, n: (b, 0, n)),    # spans^T
                    pl.BlockSpec((H, H), lambda b, n: (0, 0), **kw),     # W1_start^T
                    pl.BlockSpec((H, H), lambda b, n: (0, 0), **kw),     # W1_end^T
                    pl.BlockSpec((H, WMAX), lambda b, n: (0, 0), **kw),  # (emb@W1_w)^T
                    pl.BlockSpec((H, 1), lambda b, n: (0, 0), **kw),     # b1
                    pl.BlockSpec((L8, H), lambda b, n: (0, 0), **kw),    # W2^T pad
                    pl.BlockSpec((L8, 1), lambda b, n: (0, 0), **kw),    # b2 pad
                ],
                out_specs=pl.BlockSpec((1, L8, TN), lambda b, n: (b, 0, n)),
                scratch_shapes=[pltpu.VMEM((H, K), compute_dtype)],
            ),
            compiler_params=pltpu.CompilerParams(
                dimension_semantics=("parallel", "arbitrary"),
                vmem_limit_bytes=vmem_limit),
        )

    args = (ht, spans_t, w1s_t, w1e_t, wm_t, b1_t, w2_t, b2_t)
    try:
        out = jax.block_until_ready(build(True)(*args))
    except Exception:
        # pl.Buffered(1) single-buffering not supported here -> default buffers.
        out = build(False)(*args)

    # (B, L8, NP) transposed logits -> (B, N, L)
    return jnp.transpose(out, (0, 2, 1))[:, :N, :L]


def span_v2_reference(hidden_states, spans, params):
    """Pure-JAX reference matching the PyTorch forward exactly."""
    starts = spans[:, :, 0]
    ends = spans[:, :, 1]
    widths = spans[:, :, 2]
    start_emb = jnp.take_along_axis(hidden_states, starts[:, :, None], axis=1)
    end_emb = jnp.take_along_axis(hidden_states, ends[:, :, None], axis=1)
    width_emb = params["width_embedding"][widths]
    x = jnp.concatenate([start_emb, end_emb, width_emb], axis=-1)
    h = jnp.maximum(x @ params["w1"] + params["b1"], 0.0)
    return h @ params["w2"] + params["b2"]


if __name__ == "__main__":
    # Small, module-consistent sizes.
    B, S, H = 2, 16, 32          # batch, seq len, hidden_size
    N = 8                        # num spans
    MAX_SPAN = 4                 # max_span_length
    WD = 16                      # width_embedding_dim
    L = 5                        # num_labels

    key = jax.random.PRNGKey(0)
    k_h, k_wt, k_w1, k_b1, k_w2, k_b2, k_s, k_w = jax.random.split(key, 8)

    hidden_states = jax.random.normal(k_h, (B, S, H), dtype=jnp.float32)

    params = {
        "width_embedding": 0.02 * jax.random.normal(k_wt, (MAX_SPAN + 1, WD), jnp.float32),
        "w1": 0.02 * jax.random.normal(k_w1, (2 * H + WD, H), jnp.float32),  # (in, out)
        "b1": 0.02 * jax.random.normal(k_b1, (H,), jnp.float32),
        "w2": 0.02 * jax.random.normal(k_w2, (H, L), jnp.float32),           # (in, out)
        "b2": 0.02 * jax.random.normal(k_b2, (L,), jnp.float32),
    }

    starts = jax.random.randint(k_s, (B, N), 0, S)
    widths = jax.random.randint(k_w, (B, N), 0, MAX_SPAN + 1)
    ends = jnp.minimum(starts + widths, S - 1)
    spans = jnp.stack([starts, ends, widths], axis=-1).astype(jnp.int32)     # (B, N, 3)

    ref = span_v2_reference(hidden_states, spans, params)

    # f32 compute path: must match the f32 reference tightly.
    logits_f32 = jax.block_until_ready(
        span_v2_forward(hidden_states, spans, params, compute_dtype=jnp.float32))
    np.testing.assert_allclose(np.asarray(logits_f32), np.asarray(ref),
                               rtol=1e-5, atol=1e-5)

    # Default bf16 MXU path (v5e/v6e/v7x): bf16 operands, f32 accumulation.
    logits_bf16 = jax.block_until_ready(
        span_v2_forward(hidden_states, spans, params))
    np.testing.assert_allclose(np.asarray(logits_bf16), np.asarray(ref),
                               rtol=5e-2, atol=1e-2)

    print("KERNEL_OK")
</pallas_src>

<mosaic_0001>
module attributes {stable_mosaic.version = 11 : i64} {
  func.func @span_v2_kernel(%arg0: i32, %arg1: i32, %arg2: memref<1x32x16xf32, #tpu.memory_space<vmem>>, %arg3: memref<1x3x8xi32, #tpu.memory_space<vmem>>, %arg4: memref<32x32xf32, #tpu.memory_space<vmem>>, %arg5: memref<32x32xf32, #tpu.memory_space<vmem>>, %arg6: memref<32x5xf32, #tpu.memory_space<vmem>>, %arg7: memref<32x1xf32, #tpu.memory_space<vmem>>, %arg8: memref<8x32xf32, #tpu.memory_space<vmem>>, %arg9: memref<8x1xf32, #tpu.memory_space<vmem>>, %arg10: memref<1x8x8xf32, #tpu.memory_space<vmem>>, %arg11: memref<32x384xf32, #tpu.memory_space<vmem>>) attributes {dimension_semantics = [#tpu.dimension_semantics<parallel>, #tpu.dimension_semantics<arbitrary>], iteration_bounds = array<i64: 2, 1>, scalar_prefetch = 0 : i64, scratch_operands = 1 : i64, tpu.core_type = #tpu.core_type<tc>, window_params = [{transform_indices = @transform_0, window_bounds = array<i64: 1, 32, 16>}, {transform_indices = @transform_1, window_bounds = array<i64: 1, 3, 8>}, {pipeline_mode = #tpu.pipeline_mode<synchronous>, transform_indices = @transform_2, window_bounds = array<i64: 32, 32>}, {pipeline_mode = #tpu.pipeline_mode<synchronous>, transform_indices = @transform_3, window_bounds = array<i64: 32, 32>}, {pipeline_mode = #tpu.pipeline_mode<synchronous>, transform_indices = @transform_4, window_bounds = array<i64: 32, 5>}, {pipeline_mode = #tpu.pipeline_mode<synchronous>, transform_indices = @transform_5, window_bounds = array<i64: 32, 1>}, {pipeline_mode = #tpu.pipeline_mode<synchronous>, transform_indices = @transform_6, window_bounds = array<i64: 8, 32>}, {pipeline_mode = #tpu.pipeline_mode<synchronous>, transform_indices = @transform_7, window_bounds = array<i64: 8, 1>}, {transform_indices = @transform_8, window_bounds = array<i64: 1, 8, 8>}]} {
    %c0_i32 = arith.constant 0 : i32
    %0 = arith.cmpi eq, %arg1, %c0_i32 : i32
    %1 = arith.extui %0 : i1 to i32
    %c0_i32_0 = arith.constant 0 : i32
    %2 = arith.cmpi ne, %1, %c0_i32_0 : i32
    scf.if %2 {
      %cst_16 = arith.constant 0.000000e+00 : f32
      %38 = vector.broadcast %cst_16 : f32 to vector<32x384xf32>
      %c0_17 = arith.constant 0 : index
      %c0_18 = arith.constant 0 : index
      %39 = vector.load %arg11[%c0_17, %c0_18] : memref<32x384xf32, #tpu.memory_space<vmem>>, vector<32x384xf32>
      tpu.vector_store %arg11[%c0_17, %c0_18], %38 {strides = array<i32>} : memref<32x384xf32, #tpu.memory_space<vmem>>, vector<32x384xf32>,
      %c0_19 = arith.constant 0 : index
      %c0_20 = arith.constant 0 : index
      %c0_21 = arith.constant 0 : index
      %40 = vector.load %arg2[%c0_19, %c0_20, %c0_21] : memref<1x32x16xf32, #tpu.memory_space<vmem>>, vector<1x32x16xf32>
      %41 = vector.shape_cast %40 : vector<1x32x16xf32> to vector<32x16xf32>
      %c0_22 = arith.constant 0 : index
      %c0_23 = arith.constant 0 : index
      %42 = vector.load %arg4[%c0_22, %c0_23] : memref<32x32xf32, #tpu.memory_space<vmem>>, vector<32x32xf32>
      %cst_24 = arith.constant dense<0.000000e+00> : vector<32x16xf32>
      %43 = tpu.matmul %42, %41, %cst_24 {dimension_numbers = #tpu.dot_dimension_numbers<[1], [0], [0], [1], [0, 0, 1, 1], [], []>} : vector<32x32xf32>, vector<32x16xf32>, vector<32x16xf32> -> vector<32x16xf32>
      %c0_25 = arith.constant 0 : index
      %c0_26 = arith.constant 0 : index
      %44 = vector.load %arg11[%c0_25, %c0_26] : memref<32x384xf32, #tpu.memory_space<vmem>>, vector<32x16xf32>
      tpu.vector_store %arg11[%c0_25, %c0_26], %43 {strides = array<i32>} : memref<32x384xf32, #tpu.memory_space<vmem>>, vector<32x16xf32>,
      %c0_27 = arith.constant 0 : index
      %c0_28 = arith.constant 0 : index
      %45 = vector.load %arg5[%c0_27, %c0_28] : memref<32x32xf32, #tpu.memory_space<vmem>>, vector<32x32xf32>
      %cst_29 = arith.constant dense<0.000000e+00> : vector<32x16xf32>
      %46 = tpu.matmul %45, %41, %cst_29 {dimension_numbers = #tpu.dot_dimension_numbers<[1], [0], [0], [1], [0, 0, 1, 1], [], []>} : vector<32x32xf32>, vector<32x16xf32>, vector<32x16xf32> -> vector<32x16xf32>
      %c0_30 = arith.constant 0 : index
      %c128 = arith.constant 128 : index
      %47 = vector.load %arg11[%c0_30, %c128] : memref<32x384xf32, #tpu.memory_space<vmem>>, vector<32x16xf32>
      tpu.vector_store %arg11[%c0_30, %c128], %46 {strides = array<i32>} : memref<32x384xf32, #tpu.memory_space<vmem>>, vector<32x16xf32>,
      %c0_31 = arith.constant 0 : index
      %c0_32 = arith.constant 0 : index
      %48 = vector.load %arg6[%c0_31, %c0_32] : memref<32x5xf32, #tpu.memory_space<vmem>>, vector<32x5xf32>
      %c0_33 = arith.constant 0 : index
      %c256 = arith.constant 256 : index
      %49 = vector.load %arg11[%c0_33, %c256] : memref<32x384xf32, #tpu.memory_space<vmem>>, vector<32x5xf32>
      tpu.vector_store %arg11[%c0_33, %c256], %48 {strides = array<i32>} : memref<32x384xf32, #tpu.memory_space<vmem>>, vector<32x5xf32>,
    } else {
    }
    %c0 = arith.constant 0 : index
    %c0_1 = arith.constant 0 : index
    %c0_2 = arith.constant 0 : index
    %3 = vector.load %arg3[%c0, %c0_1, %c0_2] : memref<1x3x8xi32, #tpu.memory_space<vmem>>, vector<1x3x8xi32>
    %4 = vector.shape_cast %3 : vector<1x3x8xi32> to vector<3x8xi32>
    %5 = vector.extract_strided_slice %4 {offsets = [0, 0], sizes = [1, 8], strides = [1, 1]} : vector<3x8xi32> to vector<1x8xi32>
    %6 = vector.extract_strided_slice %4 {offsets = [1, 0], sizes = [1, 8], strides = [1, 1]} : vector<3x8xi32> to vector<1x8xi32>
    %c128_i32 = arith.constant 128 : i32
    %7 = vector.broadcast %c128_i32 : i32 to vector<1x8xi32>
    %8 = arith.addi %6, %7 : vector<1x8xi32>
    %9 = vector.extract_strided_slice %4 {offsets = [2, 0], sizes = [1, 8], strides = [1, 1]} : vector<3x8xi32> to vector<1x8xi32>
    %c256_i32 = arith.constant 256 : i32
    %10 = vector.broadcast %c256_i32 : i32 to vector<1x8xi32>
    %11 = arith.addi %9, %10 : vector<1x8xi32>
    %12 = tpu.iota {dimensions = array<i32: 0>} : vector<384x8xi32>
    %13 = vector.broadcast %5 : vector<1x8xi32> to vector<384x8xi32>
    %14 = arith.cmpi eq, %12, %13 : vector<384x8xi32>
    %15 = vector.broadcast %8 : vector<1x8xi32> to vector<384x8xi32>
    %16 = arith.cmpi eq, %12, %15 : vector<384x8xi32>
    %17 = arith.ori %14, %16 : vector<384x8xi1>
    %18 = vector.broadcast %11 : vector<1x8xi32> to vector<384x8xi32>
    %19 = arith.cmpi eq, %12, %18 : vector<384x8xi32>
    %20 = arith.ori %17, %19 : vector<384x8xi1>
    %21 = arith.extui %20 : vector<384x8xi1> to vector<384x8xi32>
    %22 = arith.sitofp %21 : vector<384x8xi32> to vector<384x8xf32>
    %c0_3 = arith.constant 0 : index
    %c0_4 = arith.constant 0 : index
    %23 = vector.load %arg11[%c0_3, %c0_4] : memref<32x384xf32, #tpu.memory_space<vmem>>, vector<32x384xf32>
    %cst = arith.constant dense<0.000000e+00> : vector<32x8xf32>
    %24 = tpu.matmul %23, %22, %cst {dimension_numbers = #tpu.dot_dimension_numbers<[1], [0], [0], [1], [0, 0, 1, 1], [], []>} : vector<32x384xf32>, vector<384x8xf32>, vector<32x8xf32> -> vector<32x8xf32>
    %c0_5 = arith.constant 0 : index
    %c0_6 = arith.constant 0 : index
    %25 = vector.load %arg7[%c0_5, %c0_6] : memref<32x1xf32, #tpu.memory_space<vmem>>, vector<32x1xf32>
    %26 = vector.broadcast %25 : vector<32x1xf32> to vector<32x8xf32>
    %27 = arith.addf %24, %26 : vector<32x8xf32>
    %cst_7 = arith.constant 0.000000e+00 : f32
    %28 = vector.broadcast %cst_7 : f32 to vector<32x8xf32>
    %29 = arith.maximumf %27, %28 : vector<32x8xf32>
    %c0_8 = arith.constant 0 : index
    %c0_9 = arith.constant 0 : index
    %30 = vector.load %arg8[%c0_8, %c0_9] : memref<8x32xf32, #tpu.memory_space<vmem>>, vector<8x32xf32>
    %cst_10 = arith.constant dense<0.000000e+00> : vector<8x8xf32>
    %31 = tpu.matmul %30, %29, %cst_10 {dimension_numbers = #tpu.dot_dimension_numbers<[1], [0], [0], [1], [0, 0, 1, 1], [], []>} : vector<8x32xf32>, vector<32x8xf32>, vector<8x8xf32> -> vector<8x8xf32>
    %c0_11 = arith.constant 0 : index
    %c0_12 = arith.constant 0 : index
    %32 = vector.load %arg9[%c0_11, %c0_12] : memref<8x1xf32, #tpu.memory_space<vmem>>, vector<8x1xf32>
    %33 = vector.broadcast %32 : vector<8x1xf32> to vector<8x8xf32>
    %34 = arith.addf %31, %33 : vector<8x8xf32>
    %c0_13 = arith.constant 0 : index
    %c0_14 = arith.constant 0 : index
    %c0_15 = arith.constant 0 : index
    %35 = vector.load %arg10[%c0_13, %c0_14, %c0_15] : memref<1x8x8xf32, #tpu.memory_space<vmem>>, vector<1x8x8xf32>
    %36 = vector.shape_cast %35 : vector<1x8x8xf32> to vector<8x8xf32>
    %37 = vector.shape_cast %34 : vector<8x8xf32> to vector<1x8x8xf32>
    tpu.vector_store %arg10[%c0_13, %c0_14, %c0_15], %37 {strides = array<i32>} : memref<1x8x8xf32, #tpu.memory_space<vmem>>, vector<1x8x8xf32>,
    return
  }
  func.func @transform_0(%arg0: i32, %arg1: i32) -> (i32, i32, i32) {
    %c0_i32 = arith.constant 0 : i32
    %c0_i32_0 = arith.constant 0 : i32
    %c0_i32_1 = arith.constant 0 : i32
    return %arg0, %c0_i32, %c0_i32_0 : i32, i32, i32
  }
  func.func @transform_1(%arg0: i32, %arg1: i32) -> (i32, i32, i32) {
    %c0_i32 = arith.constant 0 : i32
    %c0_i32_0 = arith.constant 0 : i32
    return %arg0, %c0_i32, %arg1 : i32, i32, i32
  }
  func.func @transform_2(%arg0: i32, %arg1: i32) -> (i32, i32) {
    %c0_i32 = arith.constant 0 : i32
    %c0_i32_0 = arith.constant 0 : i32
    %c0_i32_1 = arith.constant 0 : i32
    return %c0_i32, %c0_i32_0 : i32, i32
  }
  func.func @transform_3(%arg0: i32, %arg1: i32) -> (i32, i32) {
    %c0_i32 = arith.constant 0 : i32
    %c0_i32_0 = arith.constant 0 : i32
    %c0_i32_1 = arith.constant 0 : i32
    return %c0_i32, %c0_i32_0 : i32, i32
  }
  func.func @transform_4(%arg0: i32, %arg1: i32) -> (i32, i32) {
    %c0_i32 = arith.constant 0 : i32
    %c0_i32_0 = arith.constant 0 : i32
    %c0_i32_1 = arith.constant 0 : i32
    return %c0_i32, %c0_i32_0 : i32, i32
  }
  func.func @transform_5(%arg0: i32, %arg1: i32) -> (i32, i32) {
    %c0_i32 = arith.constant 0 : i32
    %c0_i32_0 = arith.constant 0 : i32
    %c0_i32_1 = arith.constant 0 : i32
    return %c0_i32, %c0_i32_0 : i32, i32
  }
  func.func @transform_6(%arg0: i32, %arg1: i32) -> (i32, i32) {
    %c0_i32 = arith.constant 0 : i32
    %c0_i32_0 = arith.constant 0 : i32
    %c0_i32_1 = arith.constant 0 : i32
    return %c0_i32, %c0_i32_0 : i32, i32
  }
  func.func @transform_7(%arg0: i32, %arg1: i32) -> (i32, i32) {
    %c0_i32 = arith.constant 0 : i32
    %c0_i32_0 = arith.constant 0 : i32
    %c0_i32_1 = arith.constant 0 : i32
    return %c0_i32, %c0_i32_0 : i32, i32
  }
  func.func @transform_8(%arg0: i32, %arg1: i32) -> (i32, i32, i32) {
    %c0_i32 = arith.constant 0 : i32
    %c0_i32_0 = arith.constant 0 : i32
    return %arg0, %c0_i32, %arg1 : i32, i32, i32
  }
}

module attributes {stable_mosaic.version = 11 : i64} {
  func.func @span_v2_kernel(%arg0: i32, %arg1: i32, %arg2: memref<1x32x16xf32, #tpu.memory_space<vmem>>, %arg3: memref<1x3x8xi32, #tpu.memory_space<vmem>>, %arg4: memref<32x32xf32, #tpu.memory_space<vmem>>, %arg5: memref<32x32xf32, #tpu.memory_space<vmem>>, %arg6: memref<32x5xf32, #tpu.memory_space<vmem>>, %arg7: memref<32x1xf32, #tpu.memory_space<vmem>>, %arg8: memref<8x32xf32, #tpu.memory_space<vmem>>, %arg9: memref<8x1xf32, #tpu.memory_space<vmem>>, %arg10: memref<1x8x8xf32, #tpu.memory_space<vmem>>, %arg11: memref<32x384xf32, #tpu.memory_space<vmem>>) attributes {dimension_semantics = [#tpu.dimension_semantics<parallel>, #tpu.dimension_semantics<arbitrary>], iteration_bounds = array<i64: 2, 1>, scalar_prefetch = 0 : i64, scratch_operands = 1 : i64, tpu.core_type = #tpu.core_type<tc>, window_params = [{transform_indices = @transform_0, window_bounds = array<i64: 1, 32, 16>}, {transform_indices = @transform_1, window_bounds = array<i64: 1, 3, 8>}, {pipeline_mode = #tpu.pipeline_mode<synchronous>, transform_indices = @transform_2, window_bounds = array<i64: 32, 32>}, {pipeline_mode = #tpu.pipeline_mode<synchronous>, transform_indices = @transform_3, window_bounds = array<i64: 32, 32>}, {pipeline_mode = #tpu.pipeline_mode<synchronous>, transform_indices = @transform_4, window_bounds = array<i64: 32, 5>}, {pipeline_mode = #tpu.pipeline_mode<synchronous>, transform_indices = @transform_5, window_bounds = array<i64: 32, 1>}, {pipeline_mode = #tpu.pipeline_mode<synchronous>, transform_indices = @transform_6, window_bounds = array<i64: 8, 32>}, {pipeline_mode = #tpu.pipeline_mode<synchronous>, transform_indices = @transform_7, window_bounds = array<i64: 8, 1>}, {transform_indices = @transform_8, window_bounds = array<i64: 1, 8, 8>}]} {
    %c0_i32 = arith.constant 0 : i32
    %0 = arith.cmpi eq, %arg1, %c0_i32 : i32
    %1 = arith.extui %0 : i1 to i32
    %c0_i32_0 = arith.constant 0 : i32
    %2 = arith.cmpi ne, %1, %c0_i32_0 : i32
    scf.if %2 {
      %cst_16 = arith.constant 0.000000e+00 : f32
      %38 = vector.broadcast %cst_16 : f32 to vector<32x384xf32>
      %c0_17 = arith.constant 0 : index
      %c0_18 = arith.constant 0 : index
      %39 = vector.load %arg11[%c0_17, %c0_18] : memref<32x384xf32, #tpu.memory_space<vmem>>, vector<32x384xf32>
      tpu.vector_store %arg11[%c0_17, %c0_18], %38 {strides = array<i32>} : memref<32x384xf32, #tpu.memory_space<vmem>>, vector<32x384xf32>,
      %c0_19 = arith.constant 0 : index
      %c0_20 = arith.constant 0 : index
      %c0_21 = arith.constant 0 : index
      %40 = vector.load %arg2[%c0_19, %c0_20, %c0_21] : memref<1x32x16xf32, #tpu.memory_space<vmem>>, vector<1x32x16xf32>
      %41 = vector.shape_cast %40 : vector<1x32x16xf32> to vector<32x16xf32>
      %c0_22 = arith.constant 0 : index
      %c0_23 = arith.constant 0 : index
      %42 = vector.load %arg4[%c0_22, %c0_23] : memref<32x32xf32, #tpu.memory_space<vmem>>, vector<32x32xf32>
      %cst_24 = arith.constant dense<0.000000e+00> : vector<32x16xf32>
      %43 = tpu.matmul %42, %41, %cst_24 {dimension_numbers = #tpu.dot_dimension_numbers<[1], [0], [0], [1], [0, 0, 1, 1], [], []>} : vector<32x32xf32>, vector<32x16xf32>, vector<32x16xf32> -> vector<32x16xf32>
      %c0_25 = arith.constant 0 : index
      %c0_26 = arith.constant 0 : index
      %44 = vector.load %arg11[%c0_25, %c0_26] : memref<32x384xf32, #tpu.memory_space<vmem>>, vector<32x16xf32>
      tpu.vector_store %arg11[%c0_25, %c0_26], %43 {strides = array<i32>} : memref<32x384xf32, #tpu.memory_space<vmem>>, vector<32x16xf32>,
      %c0_27 = arith.constant 0 : index
      %c0_28 = arith.constant 0 : index
      %45 = vector.load %arg5[%c0_27, %c0_28] : memref<32x32xf32, #tpu.memory_space<vmem>>, vector<32x32xf32>
      %cst_29 = arith.constant dense<0.000000e+00> : vector<32x16xf32>
      %46 = tpu.matmul %45, %41, %cst_29 {dimension_numbers = #tpu.dot_dimension_numbers<[1], [0], [0], [1], [0, 0, 1, 1], [], []>} : vector<32x32xf32>, vector<32x16xf32>, vector<32x16xf32> -> vector<32x16xf32>
      %c0_30 = arith.constant 0 : index
      %c128 = arith.constant 128 : index
      %47 = vector.load %arg11[%c0_30, %c128] : memref<32x384xf32, #tpu.memory_space<vmem>>, vector<32x16xf32>
      tpu.vector_store %arg11[%c0_30, %c128], %46 {strides = array<i32>} : memref<32x384xf32, #tpu.memory_space<vmem>>, vector<32x16xf32>,
      %c0_31 = arith.constant 0 : index
      %c0_32 = arith.constant 0 : index
      %48 = vector.load %arg6[%c0_31, %c0_32] : memref<32x5xf32, #tpu.memory_space<vmem>>, vector<32x5xf32>
      %c0_33 = arith.constant 0 : index
      %c256 = arith.constant 256 : index
      %49 = vector.load %arg11[%c0_33, %c256] : memref<32x384xf32, #tpu.memory_space<vmem>>, vector<32x5xf32>
      tpu.vector_store %arg11[%c0_33, %c256], %48 {strides = array<i32>} : memref<32x384xf32, #tpu.memory_space<vmem>>, vector<32x5xf32>,
    } else {
    }
    %c0 = arith.constant 0 : index
    %c0_1 = arith.constant 0 : index
    %c0_2 = arith.constant 0 : index
    %3 = vector.load %arg3[%c0, %c0_1, %c0_2] : memref<1x3x8xi32, #tpu.memory_space<vmem>>, vector<1x3x8xi32>
    %4 = vector.shape_cast %3 : vector<1x3x8xi32> to vector<3x8xi32>
    %5 = vector.extract_strided_slice %4 {offsets = [0, 0], sizes = [1, 8], strides = [1, 1]} : vector<3x8xi32> to vector<1x8xi32>
    %6 = vector.extract_strided_slice %4 {offsets = [1, 0], sizes = [1, 8], strides = [1, 1]} : vector<3x8xi32> to vector<1x8xi32>
    %c128_i32 = arith.constant 128 : i32
    %7 = vector.broadcast %c128_i32 : i32 to vector<1x8xi32>
    %8 = arith.addi %6, %7 : vector<1x8xi32>
    %9 = vector.extract_strided_slice %4 {offsets = [2, 0], sizes = [1, 8], strides = [1, 1]} : vector<3x8xi32> to vector<1x8xi32>
    %c256_i32 = arith.constant 256 : i32
    %10 = vector.broadcast %c256_i32 : i32 to vector<1x8xi32>
    %11 = arith.addi %9, %10 : vector<1x8xi32>
    %12 = tpu.iota {dimensions = array<i32: 0>} : vector<384x8xi32>
    %13 = vector.broadcast %5 : vector<1x8xi32> to vector<384x8xi32>
    %14 = arith.cmpi eq, %12, %13 : vector<384x8xi32>
    %15 = vector.broadcast %8 : vector<1x8xi32> to vector<384x8xi32>
    %16 = arith.cmpi eq, %12, %15 : vector<384x8xi32>
    %17 = arith.ori %14, %16 : vector<384x8xi1>
    %18 = vector.broadcast %11 : vector<1x8xi32> to vector<384x8xi32>
    %19 = arith.cmpi eq, %12, %18 : vector<384x8xi32>
    %20 = arith.ori %17, %19 : vector<384x8xi1>
    %21 = arith.extui %20 : vector<384x8xi1> to vector<384x8xi32>
    %22 = arith.sitofp %21 : vector<384x8xi32> to vector<384x8xf32>
    %c0_3 = arith.constant 0 : index
    %c0_4 = arith.constant 0 : index
    %23 = vector.load %arg11[%c0_3, %c0_4] : memref<32x384xf32, #tpu.memory_space<vmem>>, vector<32x384xf32>
    %cst = arith.constant dense<0.000000e+00> : vector<32x8xf32>
    %24 = tpu.matmul %23, %22, %cst {dimension_numbers = #tpu.dot_dimension_numbers<[1], [0], [0], [1], [0, 0, 1, 1], [], []>} : vector<32x384xf32>, vector<384x8xf32>, vector<32x8xf32> -> vector<32x8xf32>
    %c0_5 = arith.constant 0 : index
    %c0_6 = arith.constant 0 : index
    %25 = vector.load %arg7[%c0_5, %c0_6] : memref<32x1xf32, #tpu.memory_space<vmem>>, vector<32x1xf32>
    %26 = vector.broadcast %25 : vector<32x1xf32> to vector<32x8xf32>
    %27 = arith.addf %24, %26 : vector<32x8xf32>
    %cst_7 = arith.constant 0.000000e+00 : f32
    %28 = vector.broadcast %cst_7 : f32 to vector<32x8xf32>
    %29 = arith.maximumf %27, %28 : vector<32x8xf32>
    %c0_8 = arith.constant 0 : index
    %c0_9 = arith.constant 0 : index
    %30 = vector.load %arg8[%c0_8, %c0_9] : memref<8x32xf32, #tpu.memory_space<vmem>>, vector<8x32xf32>
    %cst_10 = arith.constant dense<0.000000e+00> : vector<8x8xf32>
    %31 = tpu.matmul %30, %29, %cst_10 {dimension_numbers = #tpu.dot_dimension_numbers<[1], [0], [0], [1], [0, 0, 1, 1], [], []>} : vector<8x32xf32>, vector<32x8xf32>, vector<8x8xf32> -> vector<8x8xf32>
    %c0_11 = arith.constant 0 : index
    %c0_12 = arith.constant 0 : index
    %32 = vector.load %arg9[%c0_11, %c0_12] : memref<8x1xf32, #tpu.memory_space<vmem>>, vector<8x1xf32>
    %33 = vector.broadcast %32 : vector<8x1xf32> to vector<8x8xf32>
    %34 = arith.addf %31, %33 : vector<8x8xf32>
    %c0_13 = arith.constant 0 : index
    %c0_14 = arith.constant 0 : index
    %c0_15 = arith.constant 0 : index
    %35 = vector.load %arg10[%c0_13, %c0_14, %c0_15] : memref<1x8x8xf32, #tpu.memory_space<vmem>>, vector<1x8x8xf32>
    %36 = vector.shape_cast %35 : vector<1x8x8xf32> to vector<8x8xf32>
    %37 = vector.shape_cast %34 : vector<8x8xf32> to vector<1x8x8xf32>
    tpu.vector_store %arg10[%c0_13, %c0_14, %c0_15], %37 {strides = array<i32>} : memref<1x8x8xf32, #tpu.memory_space<vmem>>, vector<1x8x8xf32>,
    return
  }
  func.func @transform_0(%arg0: i32, %arg1: i32) -> (i32, i32, i32) {
    %c0_i32 = arith.constant 0 : i32
    %c0_i32_0 = arith.constant 0 : i32
    %c0_i32_1 = arith.constant 0 : i32
    return %arg0, %c0_i32, %c0_i32_0 : i32, i32, i32
  }
  func.func @transform_1(%arg0: i32, %arg1: i32) -> (i32, i32, i32) {
    %c0_i32 = arith.constant 0 : i32
    %c0_i32_0 = arith.constant 0 : i32
    return %arg0, %c0_i32, %arg1 : i32, i32, i32
  }
  func.func @transform_2(%arg0: i32, %arg1: i32) -> (i32, i32) {
    %c0_i32 = arith.constant 0 : i32
    %c0_i32_0 = arith.constant 0 : i32
    %c0_i32_1 = arith.constant 0 : i32
    return %c0_i32, %c0_i32_0 : i32, i32
  }
  func.func @transform_3(%arg0: i32, %arg1: i32) -> (i32, i32) {
    %c0_i32 = arith.constant 0 : i32
    %c0_i32_0 = arith.constant 0 : i32
    %c0_i32_1 = arith.constant 0 : i32
    return %c0_i32, %c0_i32_0 : i32, i32
  }
  func.func @transform_4(%arg0: i32, %arg1: i32) -> (i32, i32) {
    %c0_i32 = arith.constant 0 : i32
    %c0_i32_0 = arith.constant 0 : i32
    %c0_i32_1 = arith.constant 0 : i32
    return %c0_i32, %c0_i32_0 : i32, i32
  }
  func.func @transform_5(%arg0: i32, %arg1: i32) -> (i32, i32) {
    %c0_i32 = arith.constant 0 : i32
    %c0_i32_0 = arith.constant 0 : i32
    %c0_i32_1 = arith.constant 0 : i32
    return %c0_i32, %c0_i32_0 : i32, i32
  }
  func.func @transform_6(%arg0: i32, %arg1: i32) -> (i32, i32) {
    %c0_i32 = arith.constant 0 : i32
    %c0_i32_0 = arith.constant 0 : i32
    %c0_i32_1 = arith.constant 0 : i32
    return %c0_i32, %c0_i32_0 : i32, i32
  }
  func.func @transform_7(%arg0: i32, %arg1: i32) -> (i32, i32) {
    %c0_i32 = arith.constant 0 : i32
    %c0_i32_0 = arith.constant 0 : i32
    %c0_i32_1 = arith.constant 0 : i32
    return %c0_i32, %c0_i32_0 : i32, i32
  }
  func.func @transform_8(%arg0: i32, %arg1: i32) -> (i32, i32, i32) {
    %c0_i32 = arith.constant 0 : i32
    %c0_i32_0 = arith.constant 0 : i32
    return %arg0, %c0_i32, %arg1 : i32, i32, i32
  }
}

</mosaic_0001>

<bundles_post_ra>
// kernel: tpu_custom_call.1
= control target key start
LH: loop header
LB: loop body
LE: loop exit
PB: predicated region body
PF: predicated region fallthrough
CT: control target
= control target key end

     0   :  { %13 = vsyncpa [#allocation4], 0  ;;  %s1919_s0 = inlined_call_operand.vmem [shape: f32[2,32,16], index: 0, kind: input, shape index: {}]   ;;  %s1920_s1 = inlined_call_operand.vmem [shape: s32[2,3,8], index: 1, kind: input, shape index: {}]   ;;  %s1921_s2 = inlined_call_operand.vmem [shape: f32[32,32], index: 2, kind: input, shape index: {}]   ;;  %s1922_s3 = inlined_call_operand.vmem [shape: f32[32,32], index: 3, kind: input, shape index: {}]   ;;  %s1923_s4 = inlined_call_operand.vmem [shape: f32[32,5], index: 4, kind: input, shape index: {}]   ;;  %s1924_s5 = inlined_call_operand.vmem [shape: f32[32,1], index: 5, kind: input, shape index: {}]   ;;  %s1925_s6 = inlined_call_operand.vmem [shape: f32[8,32], index: 6, kind: input, shape index: {}]   ;;  %s1926_s7 = inlined_call_operand.vmem [shape: f32[8,1], index: 7, kind: input, shape index: {}]   ;;  %s1927_s8 = inlined_call_operand.hbm [shape: f32[2,8,8], index: 8, kind: output, shape index: {}]  }
   0x1   :  { %15 = vsyncpa [#allocation4 + $0x1], 0  ;;  %s1450_s27 = smov 0   ;;  %s1452_s28 = smov 0  }
   0x2   :  { %s1454_s29 = smov 0   ;;  %s1456_s30 = smov 0  }
   0x3   :  { %s1458_s9 = smov 0   ;;  %s1460_s10 = smov 0  }
   0x4 LB: > { %s1126_s11 = sadd.s32 4294967295, %s1400_s10   ;;  %s1127_s12 = sadd.s32 4294967294, %s1400_s10   ;;  %s1400_s10 = sphi %s1460_s10, %s21_s10   ;;  %s1396_s9 = sphi %s1458_s9, %s1938_s9   ;;  %s1392_s30 = sphi %s1456_s30, %s1937_s30   ;;  %s1388_s29 = sphi %s1454_s29, %s1936_s29   ;;  %s1384_s28 = sphi %s1452_s28, %s1935_s28   ;;  %s1380_s27 = sphi %s1450_s27, %s1934_s27  }
   0x5   : > { %s33_s13 = sadd.s32 1, %s1396_s9  ;;  %s222_s14 = sadd.s32 1, %s1388_s29 }
   0x6   : > { %p35_p0 = scmp.ge.s32.totalorder %s33_s13, 2  ;;  %p232_p1 = scmp.ne.s32.totalorder %s1388_s29, %s1384_s28 }
   0x7   : > { %p233_p2 = scmp.eq.s32.totalorder %s1126_s11, 1  ;;  %p238_p3 = scmp.ne.s32.totalorder %s1384_s28, %s1380_s27 }
   0x8   : > { %s1940_s13 = smov (%p35_p0, %s33_s13), 0  ;;  %p239_p5 = scmp.eq.s32.totalorder %s1127_s12, 1 }
   0x9   : > { %p1490_p4 = por %p233_p2, %p232_p1  ;;  %s217_s16 = ssub.s32 %s1396_s9, %s1940_s13 }
   0xa   : > { %p1130_p6 = scmp.ge.s32.totalorder %s1400_s10, 1  ;;  %p220_p7 = scmp.eq.s32.totalorder %s217_s16, 0 }
   0xb   : > { %p1497_p8 = por %p239_p5, %p238_p3  ;;  %p293_p9 = scmp.lt.s32.totalorder %s1400_s10, 3 }
   0xc   : > { %s1503_s18 = scalar_select %p220_p7, %s1388_s29, %s222_s14  }
   0xd   : > { %p294_p10 = pnand %p1130_p6, %p293_p9 }
   0xe   : > { %p334_p11 = scmp.lt.s32.totalorder (!%p294_p10), %s1392_s30, 1  ;;  %s331_s12 = sand.u32 (!%p294_p10), 1, %s1384_s28  }
   0xf   : > { %297 = sbr.rel (%p294_p10) target bundleno = 468 (0x1d4), region = 52  ;;  %s1131_s14 = sshll.u32 (!%p294_p10), %s331_s12, 3 }
  0x10   : > { %s1241_s16 = sshll.u32 (!%p294_p10), %s1392_s30, 3  ;;  %s333_s22 = scalar_lea.vmem (!%p294_p10), [#allocation3], %s1131_s14 }
  0x11   : > { %s1040_s23 = sshll.u32 (!%p294_p10), %s333_s22, 4  ;;  %s1027_s25 = scalar_lea.sflag (!%p294_p10), [#allocation4], %s331_s12  ;;  %s1041_s23 = int_to_ptr.vmem [resolvable:$true] %s1040_s23 }
  0x12   : > { %s1342_s14 = scalar_lea.hbm (!%p294_p10), %s1927_s8, 16 }
  0x14   : > { %s335_s19 = scalar_select %p334_p11, %s1392_s30, 1  ;;  %v478_v3 = vlaneseq  ;;  %v366_v15 = vld [vmem:[%s1921_s2] sm:$0xff]  ;;  %vm1928_vm0 = vcmask 261120   ;;  %v1402_v19 = vmov 1.0   ;;  %v367_v22 = vld [vmem:[%s1921_s2 + $0x8] sm:$0xff]  ;;  %v368_v28 = vld [vmem:[%s1921_s2 + $0x10] sm:$0xff] }
  0x15   : > { %v417_v16 = vld [vmem:[%s1922_s3] sm:$0xff]  ;;  %v418_v23 = vld [vmem:[%s1922_s3 + $0x8] sm:$0xff]  ;;  %v419_v29 = vld [vmem:[%s1922_s3 + $0x10] sm:$0xff]  ;;  %v1403_v39 = vmov 0.0  }
  0x16   : > { %s1244_s20 = sshll.u32 %s335_s19, 5  ;;  %s1134_s21 = sshll.u32 %s335_s19, 2  ;;  %v1515_v8 = vshrl.u32 %v478_v3, 7  ;;  %v369_v34 = vld [vmem:[%s1921_s2 + $0x18] sm:$0xff]  ;;  %350 = vst [vmem:[#allocation2] sm:$0xff] %v1403_v39  ;;  %v466_v60 = vld [vmem:[%s1923_s4] sm:$0xff] }
  0x17   : > { %s338_s24 = scalar_lea.vmem %s1919_s0, %s1244_s20  ;;  %s345_s11 = scalar_lea.vmem %s1920_s1, %s1134_s21  ;;  %v420_v35 = vld [vmem:[%s1922_s3 + $0x18] sm:$0xff]  ;;  %351 = vst [vmem:[#allocation2 + $0x8] sm:$0xff] %v1403_v39 }
  0x18   : > { %v365_v0 = vld [vmem:[%s338_s24 + $0x18] sm:$0xff]  ;;  %v475_v1 = vld [vmem:[%s345_s11] sm:$0x7]  ;;  %v364_v2 = vld [vmem:[%s338_s24 + $0x10] sm:$0xff]  ;;  %v494_v12 = vadd.s32 120, %v1515_v8  ;;  %v493_v13 = vadd.s32 112, %v1515_v8  ;;  %s1038_s21 = scalar_lea.hbm %s1927_s8, %s1241_s16 }
  0x19   : > { %395 = vmatpush.msra.mxu0 %v365_v0  ;;  %v476_v4 = vadd.s32 128, %v475_v1  ;;  %v477_v5 = vadd.s32 256, %v475_v1  ;;  %445 = vmatpush.msra.mxu1 %v365_v0  ;;  %v1513_v6 = vperm.slane %v475_v1, 0  ;;  %v363_v7 = vld [vmem:[%s338_s24 + $0x8] sm:$0xff]  ;;  %v362_v11 = vld [vmem:[%s338_s24] sm:$0xff]  ;;  %v510_v14 = vadd.s32 248, %v1515_v8 }
  0x1a   : > { %v492_v17 = vadd.s32 104, %v1515_v8  ;;  %v509_v18 = vadd.s32 240, %v1515_v8  ;;  %v491_v20 = vadd.s32 96, %v1515_v8  ;;  %v508_v21 = vadd.s32 232, %v1515_v8  ;;  %352 = vst [vmem:[#allocation2 + $0x10] sm:$0xff] %v1403_v39  ;;  %v879_v1 = vld [vmem:[%s1924_s5 + $0x8] sm:$0xff] }
  0x1b   : > { %v1517_v9 = vperm.slane %v476_v4, 1  ;;  %v1519_v10 = vperm.slane %v477_v5, 2  ;;  %396 = vmatpush.msra.mxu0 %v364_v2  ;;  %446 = vmatpush.msra.mxu1 %v364_v2  ;;  %vm543_vm1 = vcmp.eq.s32.totalorder %v494_v12, %v1513_v6  ;;  %vm542_vm4 = vcmp.eq.s32.totalorder %v493_v13, %v1513_v6  ;;  %353 = vst [vmem:[#allocation2 + $0x18] sm:$0xff] %v1403_v39  ;;  %v467_v2 = vld [vmem:[%s1923_s4 + $0x8] sm:$0xff]  ;;  %s1042_s24 = sshll.u32 %s1038_s21, 4  ;;  %s1043_s24 = int_to_ptr.hbm [resolvable:$true] %s1042_s24 }
  0x1c   : > { %vm559_vm9 = vcmp.eq.s32.totalorder %v510_v14, %v1513_v6  ;;  %vm541_vm14 = vcmp.eq.s32.totalorder %v492_v17, %v1513_v6  ;;  %v490_v24 = vadd.s32 88, %v1515_v8  ;;  %v507_v25 = vadd.s32 224, %v1515_v8  ;;  %354 = vst [vmem:[#allocation2 + $0x20] sm:$0xff] %v1403_v39  ;;  %s1336_s26 = sshra.s32 %s1043_s24, 4  ;;  %s1337_s26 = int_to_ptr.hbm [resolvable:$true] %s1336_s26 }
  0x1d   : > { %397 = vmatpush.msra.mxu0 %v363_v7  ;;  %447 = vmatpush.msra.mxu1 %v363_v7  ;;  %vm592_vm2 = vcmp.eq.s32.totalorder %v494_v12, %v1517_v9  ;;  %vm689_vm3 = vcmp.eq.s32.totalorder %v494_v12, %v1519_v10  ;;  %vm591_vm6 = vcmp.eq.s32.totalorder %v493_v13, %v1517_v9  ;;  %v489_v26 = vadd.s32 80, %v1515_v8  ;;  %v468_v12 = vld [vmem:[%s1923_s4 + $0x10] sm:$0xff]  ;;  %s1338_s11 = scalar_lea.hbm %s1337_s26, 8  ;;  %p1343_p1 = scmp.lt.s32.totalorder %s1337_s26, %s1927_s8 }
  0x1e   : > { %vm640_vm5 = vmor %vm543_vm1, %vm592_vm2  ;;  %vm688_vm7 = vcmp.eq.s32.totalorder %v493_v13, %v1519_v10  ;;  %vm608_vm10 = vcmp.eq.s32.totalorder %v510_v14, %v1517_v9  ;;  %vm705_vm12 = vcmp.eq.s32.totalorder %v510_v14, %v1519_v10  ;;  %vm590_vm15 = vcmp.eq.s32.totalorder %v492_v17, %v1517_v9  ;;  %355 = vst [vmem:[#allocation2 + $0x28] sm:$0xff] %v1403_v39  ;;  %p1339_p12 = scmp.ne.s32.totalorder %s1337_s26, %s1338_s11  ;;  %p1344_p2 = scmp.lt.s32.totalorder %s1342_s14, %s1338_s11 }
  0x1f   : > { %398 = vmatpush.msra.mxu0 %v362_v11  ;;  %448 = vmatpush.msra.mxu1 %v362_v11  ;;  %vm737_vm8 = vmor %vm640_vm5, %vm689_vm3  ;;  %vm687_vm2 = vcmp.eq.s32.totalorder %v492_v17, %v1519_v10  ;;  %vm558_vm5 = vcmp.eq.s32.totalorder %v509_v18, %v1513_v6  ;;  %v506_v27 = vadd.s32 216, %v1515_v8  ;;  %v526_v30 = vadd.s32 376, %v1515_v8  ;;  %356 = vst [vmem:[#allocation2 + $0x30] sm:$0xff] %v1403_v39  ;;  %v878_v11 = vld [vmem:[%s1924_s5] sm:$0xff] }
  0x20   : > { %1135 = vmatmul.msk.f32.vlgmr.msra.gmra.mxu0 %vm1928_vm0, %v366_v15  ;;  %1139 = vmatmul.msk.f32.vlgmr.msra.gmra.mxu1 %vm1928_vm0, %v417_v16  ;;  %vm639_vm11 = vmor %vm542_vm4, %vm591_vm6  ;;  %vm704_vm6 = vcmp.eq.s32.totalorder %v509_v18, %v1519_v10  ;;  %v488_v31 = vadd.s32 72, %v1515_v8  ;;  %v505_v32 = vadd.s32 208, %v1515_v8  ;;  %v525_v33 = vadd.s32 368, %v1515_v8  ;;  %357 = vst [vmem:[#allocation2 + $0x38] sm:$0xff] %v1403_v39  ;;  %p1340_p13 = pnand %p1339_p12, %p1490_p4  ;;  %p1345_p3 = por %p1344_p2, %p1343_p1 }
  0x21   : > { %1191 = vmatpush.msk.msra.mxu2 %vm737_vm8, %v1402_v19  ;;  %vm736_vm13 = vmor %vm639_vm11, %vm688_vm7  ;;  %vm607_vm8 = vcmp.eq.s32.totalorder %v509_v18, %v1517_v9  ;;  %v487_v37 = vadd.s32 64, %v1515_v8  ;;  %v504_v38 = vadd.s32 200, %v1515_v8  ;;  %v524_v40 = vadd.s32 360, %v1515_v8  ;;  %358 = vst [vmem:[#allocation2 + $0x40] sm:$0xff] %v1403_v39  ;;  %v469_v18 = vld [vmem:[%s1923_s4 + $0x18] sm:$0xff] }
  0x22   : > { %vm656_vm1 = vmor %vm559_vm9, %vm608_vm10  ;;  %vm540_vm9 = vcmp.eq.s32.totalorder %v491_v20, %v1513_v6  ;;  %vm589_vm10 = vcmp.eq.s32.totalorder %v491_v20, %v1517_v9  ;;  %v486_v41 = vadd.s32 56, %v1515_v8  ;;  %v503_v42 = vadd.s32 192, %v1515_v8  ;;  %359 = vst [vmem:[#allocation2 + $0x48] sm:$0xff] %v1403_v39  ;;  %p1341_p0 = pneg %p1340_p13 }
  0x23   : > { %1192 = vmatpush.msk.msra.mxu2 %vm736_vm13, %v1402_v19  ;;  %vm753_vm3 = vmor %vm656_vm1, %vm705_vm12  ;;  %vm686_vm12 = vcmp.eq.s32.totalorder %v491_v20, %v1519_v10  ;;  %v523_v43 = vadd.s32 352, %v1515_v8  ;;  %v485_v44 = vadd.s32 48, %v1515_v8  ;;  %360 = vst [vmem:[#allocation2 + $0x50] sm:$0xff] %v1403_v39  ;;  %v502_v45 = vadd.s32 184, %v1515_v8 }
  0x24   : > { %1207 = vmatpush.msk.msra.mxu3 %vm753_vm3, %v1402_v19  ;;  %vm638_vm4 = vmor %vm541_vm14, %vm590_vm15  ;;  %vm557_vm14 = vcmp.eq.s32.totalorder %v508_v21, %v1513_v6  ;;  %vm606_vm15 = vcmp.eq.s32.totalorder %v508_v21, %v1517_v9  ;;  %361 = vst [vmem:[#allocation2 + $0x58] sm:$0xff] %v1403_v39  ;;  %v522_v46 = vadd.s32 344, %v1515_v8  ;;  %v484_v47 = vadd.s32 40, %v1515_v8  ;;  %p1346_p5 = pnand %p1345_p3, %p1341_p0 }
  0x25   : > { %vm735_vm7 = vmor %vm638_vm4, %vm687_vm2  ;;  %vm703_vm2 = vcmp.eq.s32.totalorder %v508_v21, %v1519_v10  ;;  %v501_v48 = vadd.s32 176, %v1515_v8  ;;  %v521_v49 = vadd.s32 336, %v1515_v8  ;;  %v483_v50 = vadd.s32 32, %v1515_v8 }
  0x26   : > { %1193 = vmatpush.msk.msra.mxu2 %vm735_vm7, %v1402_v19  ;;  %vm655_vm11 = vmor %vm558_vm5, %vm607_vm8  ;;  %vm539_vm5 = vcmp.eq.s32.totalorder %v490_v24, %v1513_v6  ;;  %vm588_vm8 = vcmp.eq.s32.totalorder %v490_v24, %v1517_v9  ;;  %v500_v51 = vadd.s32 168, %v1515_v8  ;;  %v520_v52 = vadd.s32 328, %v1515_v8 }
  0x27   : > { %vm752_vm13 = vmor %vm655_vm11, %vm704_vm6  ;;  %vm685_vm6 = vcmp.eq.s32.totalorder %v490_v24, %v1519_v10  ;;  %vm556_vm11 = vcmp.eq.s32.totalorder %v507_v25, %v1513_v6  ;;  %v482_v53 = vadd.s32 24, %v1515_v8  ;;  %v499_v54 = vadd.s32 160, %v1515_v8 }
  0x28   : > { %1136 = vmatmul.msk.f32.gmra.mxu0 %vm1928_vm0, %v367_v22  ;;  %1140 = vmatmul.msk.f32.gmra.mxu1 %vm1928_vm0, %v418_v23  ;;  %vm637_vm1 = vmor %vm540_vm9, %vm589_vm10  ;;  %vm702_vm10 = vcmp.eq.s32.totalorder %v507_v25, %v1519_v10  ;;  %v519_v55 = vadd.s32 320, %v1515_v8  ;;  %v481_v56 = vadd.s32 16, %v1515_v8  ;;  %v498_v57 = vadd.s32 152, %v1515_v8 }
  0x29   : > { %1208 = vmatpush.msk.msra.mxu3 %vm752_vm13, %v1402_v19  ;;  %vm734_vm3 = vmor %vm637_vm1, %vm686_vm12  ;;  %vm605_vm13 = vcmp.eq.s32.totalorder %v507_v25, %v1517_v9  ;;  %v518_v58 = vadd.s32 312, %v1515_v8  ;;  %v480_v59 = vadd.s32 8, %v1515_v8  ;;  %v497_v61 = vadd.s32 144, %v1515_v8 }
  0x2a   : > { %1194 = vmatpush.msk.msra.mxu2 %vm734_vm3, %v1402_v19  ;;  %vm654_vm4 = vmor %vm557_vm14, %vm606_vm15  ;;  %vm538_vm14 = vcmp.eq.s32.totalorder %v489_v26, %v1513_v6  ;;  %vm587_vm15 = vcmp.eq.s32.totalorder %v489_v26, %v1517_v9  ;;  %v517_v62 = vadd.s32 304, %v1515_v8  ;;  %v496_v63 = vadd.s32 136, %v1515_v8 }
  0x2b   : > { %vm751_vm7 = vmor %vm654_vm4, %vm703_vm2  ;;  %vm684_vm2 = vcmp.eq.s32.totalorder %v489_v26, %v1519_v10  ;;  %v1404_v0 = vmov 0   ;;  %v516_v3 = vadd.s32 296, %v1515_v8  ;;  %v495_v4 = vadd.s32 128, %v1515_v8 }
  0x2c   : > { %1209 = vmatpush.msk.msra.mxu3 %vm751_vm7, %v1402_v19  ;;  %vm636_vm9 = vmor %vm539_vm5, %vm588_vm8  ;;  %vm555_vm5 = vcmp.eq.s32.totalorder %v506_v27, %v1513_v6  ;;  %vm604_vm8 = vcmp.eq.s32.totalorder %v506_v27, %v1517_v9  ;;  %1320 = vset.pattern.permute.xlu1 %v1404_v0  ;;  %v515_v5 = vadd.s32 288, %v1515_v8  ;;  %v514_v7 = vadd.s32 280, %v1515_v8 }
  0x2d   : > { %vm733_vm12 = vmor %vm636_vm9, %vm685_vm6  ;;  %vm701_vm6 = vcmp.eq.s32.totalorder %v506_v27, %v1519_v10  ;;  %889 = vperm.xlu1 %1320, %v879_v1   ;;  %1319 = vset.pattern.permute.xlu0 %v1404_v0  ;;  %v513_v13 = vadd.s32 272, %v1515_v8  ;;  %v512_v14 = vadd.s32 264, %v1515_v8  ;;  %v511_v15 = vadd.s32 256, %v1515_v8 }
  0x2e   : > { %1195 = vmatpush.msk.msra.mxu2 %vm733_vm12, %v1402_v19  ;;  %vm653_vm1 = vmor %vm556_vm11, %vm605_vm13  ;;  %vm575_vm11 = vcmp.eq.s32.totalorder %v526_v30, %v1513_v6  ;;  %vm624_vm13 = vcmp.eq.s32.totalorder %v526_v30, %v1517_v9  ;;  %1321 = vset.pattern.permute.xlu2 %v1404_v0 }
  0x2f   : > { %vm750_vm3 = vmor %vm653_vm1, %vm702_vm10  ;;  %vm721_vm10 = vcmp.eq.s32.totalorder %v526_v30, %v1519_v10  ;;  %vm537_vm1 = vcmp.eq.s32.totalorder %v488_v31, %v1513_v6 }
  0x30   : > { %1137 = vmatmul.msk.f32.gmra.mxu0 %vm1928_vm0, %v368_v28  ;;  %1141 = vmatmul.msk.f32.gmra.mxu1 %vm1928_vm0, %v419_v29  ;;  %vm635_vm4 = vmor %vm538_vm14, %vm587_vm15  ;;  %vm683_vm15 = vcmp.eq.s32.totalorder %v488_v31, %v1519_v10 }
  0x31   : > { %1210 = vmatpush.msk.msra.mxu3 %vm750_vm3, %v1402_v19  ;;  %vm732_vm7 = vmor %vm635_vm4, %vm684_vm2  ;;  %vm586_vm3 = vcmp.eq.s32.totalorder %v488_v31, %v1517_v9 }
  0x32   : > { %1196 = vmatpush.msk.msra.mxu2 %vm732_vm7, %v1402_v19  ;;  %vm652_vm9 = vmor %vm555_vm5, %vm604_vm8  ;;  %vm554_vm5 = vcmp.eq.s32.totalorder %v505_v32, %v1513_v6  ;;  %vm603_vm8 = vcmp.eq.s32.totalorder %v505_v32, %v1517_v9 }
  0x33   : > { %vm749_vm12 = vmor %vm652_vm9, %vm701_vm6  ;;  %vm700_vm6 = vcmp.eq.s32.totalorder %v505_v32, %v1519_v10 }
  0x34   : > { %1211 = vmatpush.msk.msra.mxu3 %vm749_vm12, %v1402_v19  ;;  %vm672_vm14 = vmor %vm575_vm11, %vm624_vm13  ;;  %vm574_vm11 = vcmp.eq.s32.totalorder %v525_v33, %v1513_v6  ;;  %vm623_vm13 = vcmp.eq.s32.totalorder %v525_v33, %v1517_v9 }
  0x35   : > { %vm1616_vm2 = vmor %vm672_vm14, %vm721_vm10  ;;  %vm720_vm10 = vcmp.eq.s32.totalorder %v525_v33, %v1519_v10  ;;  %884 = vperm.xlu1 %1320, %v878_v11  }
  0x36   : > { %1223 = vmatpush.msk.msrb.mxu0 %vm1616_vm2, %v1402_v19  ;;  %vm634_vm4 = vmor %vm537_vm1, %vm586_vm3  ;;  %1245 = vmatpush.msk.msrb.mxu1 %vm1616_vm2, %v1402_v19  ;;  %vm536_vm1 = vcmp.eq.s32.totalorder %v487_v37, %v1513_v6  ;;  %vm585_vm3 = vcmp.eq.s32.totalorder %v487_v37, %v1517_v9  ;;  %vm553_vm2 = vcmp.eq.s32.totalorder %v504_v38, %v1513_v6 }
  0x37   : > { %vm731_vm7 = vmor %vm634_vm4, %vm683_vm15  ;;  %vm682_vm15 = vcmp.eq.s32.totalorder %v487_v37, %v1519_v10 }
  0x38   : > { %1138 = vmatmul.msk.f32.gmra.mxu0 %vm1928_vm0, %v369_v34  ;;  %1142 = vmatmul.msk.f32.gmra.mxu1 %vm1928_vm0, %v420_v35  ;;  %vm651_vm9 = vmor %vm554_vm5, %vm603_vm8  ;;  %vm602_vm8 = vcmp.eq.s32.totalorder %v504_v38, %v1517_v9 }
  0x39   : > { %1197 = vmatpush.msk.msra.mxu2 %vm731_vm7, %v1402_v19  ;;  %vm748_vm12 = vmor %vm651_vm9, %vm700_vm6  ;;  %vm699_vm6 = vcmp.eq.s32.totalorder %v504_v38, %v1519_v10 }
  0x3a   : > { %1212 = vmatpush.msk.msra.mxu3 %vm748_vm12, %v1402_v19  ;;  %vm671_vm14 = vmor %vm574_vm11, %vm623_vm13  ;;  %vm573_vm11 = vcmp.eq.s32.totalorder %v524_v40, %v1513_v6  ;;  %vm622_vm13 = vcmp.eq.s32.totalorder %v524_v40, %v1517_v9 }
  0x3b   : > { %vm768_vm5 = vmor %vm671_vm14, %vm720_vm10  ;;  %vm719_vm10 = vcmp.eq.s32.totalorder %v524_v40, %v1519_v10  ;;  %v994_v40 = vld [vmem:[%s1926_s7] sm:$0xff] }
  0x3c   : > { %1224 = vmatpush.msk.msrb.mxu0 %vm768_vm5, %v1402_v19  ;;  %vm633_vm4 = vmor %vm536_vm1, %vm585_vm3  ;;  %1246 = vmatpush.msk.msrb.mxu1 %vm768_vm5, %v1402_v19  ;;  %vm535_vm1 = vcmp.eq.s32.totalorder %v486_v41, %v1513_v6  ;;  %vm584_vm3 = vcmp.eq.s32.totalorder %v486_v41, %v1517_v9 }
  0x3d   : > { %vm730_vm7 = vmor %vm633_vm4, %vm682_vm15  ;;  %vm681_vm15 = vcmp.eq.s32.totalorder %v486_v41, %v1519_v10  ;;  %997 = vperm.xlu2 %1321, %v994_v40  }
  0x3e   : > { %1198 = vmatpush.msk.msra.mxu2 %vm730_vm7, %v1402_v19  ;;  %vm650_vm9 = vmor %vm553_vm2, %vm602_vm8  ;;  %vm552_vm2 = vcmp.eq.s32.totalorder %v503_v42, %v1513_v6  ;;  %vm601_vm8 = vcmp.eq.s32.totalorder %v503_v42, %v1517_v9 }
  0x3f   : > { %vm747_vm12 = vmor %vm650_vm9, %vm699_vm6  ;;  %vm698_vm6 = vcmp.eq.s32.totalorder %v503_v42, %v1519_v10 }
  0x40   : > { %1213 = vmatpush.msk.msra.mxu3 %vm747_vm12, %v1402_v19  ;;  %vm670_vm14 = vmor %vm573_vm11, %vm622_vm13  ;;  %vm572_vm11 = vcmp.eq.s32.totalorder %v523_v43, %v1513_v6  ;;  %vm621_vm13 = vcmp.eq.s32.totalorder %v523_v43, %v1517_v9 }
  0x41   : > { %vm767_vm5 = vmor %vm670_vm14, %vm719_vm10  ;;  %vm718_vm10 = vcmp.eq.s32.totalorder %v523_v43, %v1519_v10 }
  0x42   : > { %1225 = vmatpush.msk.msrb.mxu0 %vm767_vm5, %v1402_v19  ;;  %vm632_vm4 = vmor %vm535_vm1, %vm584_vm3  ;;  %1247 = vmatpush.msk.msrb.mxu1 %vm767_vm5, %v1402_v19  ;;  %vm534_vm1 = vcmp.eq.s32.totalorder %v485_v44, %v1513_v6  ;;  %vm583_vm3 = vcmp.eq.s32.totalorder %v485_v44, %v1517_v9 }
  0x43   : > { %vm729_vm7 = vmor %vm632_vm4, %vm681_vm15  ;;  %vm680_vm15 = vcmp.eq.s32.totalorder %v485_v44, %v1519_v10  ;;  %vm551_vm4 = vcmp.eq.s32.totalorder %v502_v45, %v1513_v6 }
  0x44   : > { %1199 = vmatpush.msk.msra.mxu2 %vm729_vm7, %v1402_v19  ;;  %vm649_vm9 = vmor %vm552_vm2, %vm601_vm8  ;;  %vm600_vm7 = vcmp.eq.s32.totalorder %v502_v45, %v1517_v9  ;;  %vm697_vm8 = vcmp.eq.s32.totalorder %v502_v45, %v1519_v10 }
  0x45   : > { %vm746_vm12 = vmor %vm649_vm9, %vm698_vm6  ;;  %vm571_vm9 = vcmp.eq.s32.totalorder %v522_v46, %v1513_v6 }
  0x46   : > { %1214 = vmatpush.msk.msra.mxu3 %vm746_vm12, %v1402_v19  ;;  %vm669_vm14 = vmor %vm572_vm11, %vm621_vm13  ;;  %vm620_vm11 = vcmp.eq.s32.totalorder %v522_v46, %v1517_v9 }
  0x47   : > { %vm766_vm5 = vmor %vm669_vm14, %vm718_vm10  ;;  %vm717_vm10 = vcmp.eq.s32.totalorder %v522_v46, %v1519_v10  ;;  %vm533_vm14 = vcmp.eq.s32.totalorder %v484_v47, %v1513_v6 }
  0x48   : > { %1226 = vmatpush.msk.msrb.mxu0 %vm766_vm5, %v1402_v19  ;;  %vm631_vm2 = vmor %vm534_vm1, %vm583_vm3  ;;  %1248 = vmatpush.msk.msrb.mxu1 %vm766_vm5, %v1402_v19  ;;  %vm582_vm1 = vcmp.eq.s32.totalorder %v484_v47, %v1517_v9 }
  0x49   : > { %vm728_vm6 = vmor %vm631_vm2, %vm680_vm15  ;;  %vm679_vm15 = vcmp.eq.s32.totalorder %v484_v47, %v1519_v10  ;;  %vm550_vm2 = vcmp.eq.s32.totalorder %v501_v48, %v1513_v6 }
  0x4a   : > { %1200 = vmatpush.msk.msra.mxu2 %vm728_vm6, %v1402_v19  ;;  %vm648_vm13 = vmor %vm551_vm4, %vm600_vm7  ;;  %vm599_vm6 = vcmp.eq.s32.totalorder %v501_v48, %v1517_v9  ;;  %vm696_vm7 = vcmp.eq.s32.totalorder %v501_v48, %v1519_v10 }
  0x4b   : > { %vm745_vm12 = vmor %vm648_vm13, %vm697_vm8  ;;  %vm570_vm13 = vcmp.eq.s32.totalorder %v521_v49, %v1513_v6 }
  0x4c   : > { %1215 = vmatpush.msk.msra.mxu3 %vm745_vm12, %v1402_v19  ;;  %vm668_vm3 = vmor %vm571_vm9, %vm620_vm11  ;;  %vm619_vm12 = vcmp.eq.s32.totalorder %v521_v49, %v1517_v9  ;;  %vm716_vm11 = vcmp.eq.s32.totalorder %v521_v49, %v1519_v10 }
  0x4d   : > { %vm765_vm5 = vmor %vm668_vm3, %vm717_vm10 }
  0x4e   : > { %1227 = vmatpush.msk.msrb.mxu0 %vm765_vm5, %v1402_v19  ;;  %vm630_vm4 = vmor %vm533_vm14, %vm582_vm1  ;;  %1249 = vmatpush.msk.msrb.mxu1 %vm765_vm5, %v1402_v19  ;;  %vm532_vm14 = vcmp.eq.s32.totalorder %v483_v50, %v1513_v6  ;;  %vm581_vm1 = vcmp.eq.s32.totalorder %v483_v50, %v1517_v9  ;;  %vm598_vm5 = vcmp.eq.s32.totalorder %v500_v51, %v1517_v9 }
  0x4f   : > { %vm727_vm8 = vmor %vm630_vm4, %vm679_vm15  ;;  %vm549_vm15 = vcmp.eq.s32.totalorder %v500_v51, %v1513_v6  ;;  %vm695_vm4 = vcmp.eq.s32.totalorder %v500_v51, %v1519_v10 }
  0x50   : > { %1201 = vmatpush.msk.msra.mxu2 %vm727_vm8, %v1402_v19  ;;  %vm647_vm9 = vmor %vm550_vm2, %vm599_vm6  ;;  %vm678_vm6 = vcmp.eq.s32.totalorder %v483_v50, %v1519_v10  ;;  %vm618_vm8 = vcmp.eq.s32.totalorder %v520_v52, %v1517_v9 }
  0x51   : > { %vm744_vm10 = vmor %vm647_vm9, %vm696_vm7  ;;  %vm569_vm7 = vcmp.eq.s32.totalorder %v520_v52, %v1513_v6 }
  0x52   : > { %1216 = vmatpush.msk.msra.mxu3 %vm744_vm10, %v1402_v19  ;;  %vm667_vm3 = vmor %vm570_vm13, %vm619_vm12  ;;  %vm715_vm12 = vcmp.eq.s32.totalorder %v520_v52, %v1519_v10  ;;  %vm580_vm10 = vcmp.eq.s32.totalorder %v482_v53, %v1517_v9 }
  0x53   : > { %vm764_vm0 = vmor %vm667_vm3, %vm716_vm11  ;;  %vm531_vm11 = vcmp.eq.s32.totalorder %v482_v53, %v1513_v6 }
  0x54   : > { %1228 = vmatpush.msk.msrb.mxu0 %vm764_vm0, %v1402_v19  ;;  %1250 = vmatpush.msk.msrb.mxu1 %vm764_vm0, %v1402_v19  ;;  %vm629_vm2 = vmor %vm532_vm14, %vm581_vm1  ;;  %vm677_vm14 = vcmp.eq.s32.totalorder %v482_v53, %v1519_v10 }
  0x55   : > { %vm726_vm0 = vmor %vm629_vm2, %vm678_vm6  ;;  %vm548_vm2 = vcmp.eq.s32.totalorder %v499_v54, %v1513_v6  ;;  %vm597_vm6 = vcmp.eq.s32.totalorder %v499_v54, %v1517_v9 }
  0x56   : > { %1202 = vmatpush.msk.msra.mxu2 %vm726_vm0, %v1402_v19  ;;  %vm646_vm13 = vmor %vm549_vm15, %vm598_vm5  ;;  %vm694_vm5 = vcmp.eq.s32.totalorder %v499_v54, %v1519_v10  ;;  %vm568_vm0 = vcmp.eq.s32.totalorder %v519_v55, %v1513_v6 }
  0x57   : > { %vm743_vm9 = vmor %vm646_vm13, %vm695_vm4  ;;  %vm617_vm13 = vcmp.eq.s32.totalorder %v519_v55, %v1517_v9 }
  0x58   : > { %1217 = vmatpush.msk.msra.mxu3 %vm743_vm9, %v1402_v19  ;;  %vm666_vm3 = vmor %vm569_vm7, %vm618_vm8  ;;  %vm714_vm8 = vcmp.eq.s32.totalorder %v519_v55, %v1519_v10  ;;  %vm530_vm9 = vcmp.eq.s32.totalorder %v481_v56, %v1513_v6 }
  0x59   : > { %vm763_vm1 = vmor %vm666_vm3, %vm715_vm12  ;;  %vm676_vm3 = vcmp.eq.s32.totalorder %v481_v56, %v1519_v10 }
  0x5a   : > { %1229 = vmatpush.msk.msrb.mxu0 %vm763_vm1, %v1402_v19  ;;  %vm628_vm15 = vmor %vm531_vm11, %vm580_vm10  ;;  %1251 = vmatpush.msk.msrb.mxu1 %vm763_vm1, %v1402_v19  ;;  %vm579_vm11 = vcmp.eq.s32.totalorder %v481_v56, %v1517_v9  ;;  %vm547_vm1 = vcmp.eq.s32.totalorder %v498_v57, %v1513_v6 }
  0x5b   : > { %vm725_vm4 = vmor %vm628_vm15, %vm677_vm14  ;;  %vm596_vm15 = vcmp.eq.s32.totalorder %v498_v57, %v1517_v9 }
  0x5c   : > { %1203 = vmatpush.msk.msra.mxu2 %vm725_vm4, %v1402_v19  ;;  %vm645_vm7 = vmor %vm548_vm2, %vm597_vm6  ;;  %vm693_vm6 = vcmp.eq.s32.totalorder %v498_v57, %v1519_v10 }
  0x5d   : > { %vm742_vm12 = vmor %vm645_vm7, %vm694_vm5  ;;  %vm470_vm5 = vcmask 39936  }
  0x5e   : > { %1218 = vmatpush.msk.msra.mxu3 %vm742_vm12, %v1402_v19  ;;  %vm665_vm10 = vmor %vm568_vm0, %vm617_vm13  ;;  %vm567_vm0 = vcmp.eq.s32.totalorder %v518_v58, %v1513_v6  ;;  %vm616_vm13 = vcmp.eq.s32.totalorder %v518_v58, %v1517_v9  ;;  %471 = vst.msk [vmem:[#allocation2 + $0x10] sm:$0xff] %vm470_vm5, %v466_v60 }
  0x5f   : > { %vm762_vm14 = vmor %vm665_vm10, %vm714_vm8  ;;  %vm713_vm8 = vcmp.eq.s32.totalorder %v518_v58, %v1519_v10  ;;  %472 = vst.msk [vmem:[#allocation2 + $0x28] sm:$0xff] %vm470_vm5, %v467_v2 }
  0x60   : > { %1230 = vmatpush.msk.msrb.mxu0 %vm762_vm14, %v1402_v19  ;;  %vm627_vm2 = vmor %vm530_vm9, %vm579_vm11  ;;  %1252 = vmatpush.msk.msrb.mxu1 %vm762_vm14, %v1402_v19  ;;  %vm529_vm9 = vcmp.eq.s32.totalorder %v480_v59, %v1513_v6  ;;  %vm578_vm11 = vcmp.eq.s32.totalorder %v480_v59, %v1517_v9  ;;  %473 = vst.msk [vmem:[#allocation2 + $0x40] sm:$0xff] %vm470_vm5, %v468_v12 }
  0x61   : > { %vm724_vm4 = vmor %vm627_vm2, %vm676_vm3  ;;  %vm675_vm3 = vcmp.eq.s32.totalorder %v480_v59, %v1519_v10  ;;  %vm546_vm2 = vcmp.eq.s32.totalorder %v497_v61, %v1513_v6  ;;  %474 = vst.msk [vmem:[#allocation2 + $0x58] sm:$0xff] %vm470_vm5, %v469_v18  ;;  %vm1933_vm5 = vcmask 261120  }
  0x62   : > { %1204 = vmatpush.msk.msra.mxu2 %vm724_vm4, %v1402_v19  ;;  %vm644_vm7 = vmor %vm547_vm1, %vm596_vm15  ;;  %vm595_vm4 = vcmp.eq.s32.totalorder %v497_v61, %v1517_v9  ;;  %vm692_vm15 = vcmp.eq.s32.totalorder %v497_v61, %v1519_v10 }
  0x63   : > { %vm741_vm12 = vmor %vm644_vm7, %vm693_vm6  ;;  %vm566_vm7 = vcmp.eq.s32.totalorder %v517_v62, %v1513_v6 }
  0x64   : > { %1219 = vmatpush.msk.msra.mxu3 %vm741_vm12, %v1402_v19  ;;  %vm664_vm10 = vmor %vm567_vm0, %vm616_vm13  ;;  %vm615_vm12 = vcmp.eq.s32.totalorder %v517_v62, %v1517_v9  ;;  %vm712_vm13 = vcmp.eq.s32.totalorder %v517_v62, %v1519_v10 }
  0x65   : > { %vm761_vm14 = vmor %vm664_vm10, %vm713_vm8 }
  0x66   : > { %1231 = vmatpush.msk.msrb.mxu0 %vm761_vm14, %v1402_v19  ;;  %vm626_vm1 = vmor %vm529_vm9, %vm578_vm11  ;;  %1253 = vmatpush.msk.msrb.mxu1 %vm761_vm14, %v1402_v19  ;;  %vm528_vm9 = vcmp.eq.s32.totalorder %v1515_v8, %v1513_v6  ;;  %vm577_vm11 = vcmp.eq.s32.totalorder %v1515_v8, %v1517_v9  ;;  %v871_v24 = vld [vmem:[#allocation2 + $0x28] sm:$0xff] }
  0x67   : > { %vm723_vm6 = vmor %vm626_vm1, %vm675_vm3  ;;  %vm674_vm3 = vcmp.eq.s32.totalorder %v1515_v8, %v1519_v10  ;;  %v881_v8 = vld [vmem:[%s1924_s5 + $0x18] sm:$0xff]  ;;  %v874_v29 = vld [vmem:[#allocation2 + $0x40] sm:$0xff] }
  0x68   : > { %1205 = vmatpush.msk.msra.mxu2 %vm723_vm6, %v1402_v19  ;;  %vm643_vm0 = vmor %vm546_vm2, %vm595_vm4  ;;  %vm545_vm2 = vcmp.eq.s32.totalorder %v496_v63, %v1513_v6  ;;  %vm594_vm4 = vcmp.eq.s32.totalorder %v496_v63, %v1517_v9  ;;  %899 = vperm.xlu0 %1319, %v881_v8   ;;  %v877_v23 = vld [vmem:[#allocation2 + $0x58] sm:$0xff] }
  0x69   : > { %vm740_vm8 = vmor %vm643_vm0, %vm692_vm15  ;;  %vm691_vm15 = vcmp.eq.s32.totalorder %v496_v63, %v1519_v10 }
  0x6a   : > { %1220 = vmatpush.msk.msra.mxu3 %vm740_vm8, %v1402_v19  ;;  %vm663_vm10 = vmor %vm566_vm7, %vm615_vm12  ;;  %vm565_vm7 = vcmp.eq.s32.totalorder %v516_v3, %v1513_v6  ;;  %vm614_vm12 = vcmp.eq.s32.totalorder %v516_v3, %v1517_v9 }
  0x6b   : > { %vm760_vm14 = vmor %vm663_vm10, %vm712_vm13  ;;  %vm711_vm13 = vcmp.eq.s32.totalorder %v516_v3, %v1519_v10  ;;  %vm544_vm10 = vcmp.eq.s32.totalorder %v495_v4, %v1513_v6 }
  0x6c   : > { %1232 = vmatpush.msk.msrb.mxu0 %vm760_vm14, %v1402_v19  ;;  %vm625_vm1 = vmor %vm528_vm9, %vm577_vm11  ;;  %1254 = vmatpush.msk.msrb.mxu1 %vm760_vm14, %v1402_v19  ;;  %vm593_vm9 = vcmp.eq.s32.totalorder %v495_v4, %v1517_v9 }
  0x6d   : > { %vm722_vm6 = vmor %vm625_vm1, %vm674_vm3  ;;  %vm690_vm3 = vcmp.eq.s32.totalorder %v495_v4, %v1519_v10  ;;  %v993_v4 = vld [vmem:[%s1925_s6] sm:$0xff] }
  0x6e   : > { %1206 = vmatpush.msk.msra.mxu2 %vm722_vm6, %v1402_v19  ;;  %vm642_vm0 = vmor %vm545_vm2, %vm594_vm4  ;;  %vm564_vm2 = vcmp.eq.s32.totalorder %v515_v5, %v1513_v6  ;;  %vm613_vm4 = vcmp.eq.s32.totalorder %v515_v5, %v1517_v9 }
  0x6f   : > { %vm739_vm8 = vmor %vm642_vm0, %vm691_vm15  ;;  %vm710_vm15 = vcmp.eq.s32.totalorder %v515_v5, %v1519_v10  ;;  %vm412_vm0 = vcmask 130048  }
  0x70   : > { %1221 = vmatpush.msk.msra.mxu3 %vm739_vm8, %v1402_v19  ;;  %vm662_vm11 = vmor %vm565_vm7, %vm614_vm12  ;;  %vm563_vm7 = vcmp.eq.s32.totalorder %v514_v7, %v1513_v6  ;;  %vm612_vm12 = vcmp.eq.s32.totalorder %v514_v7, %v1517_v9  ;;  %vm709_vm8 = vcmp.eq.s32.totalorder %v514_v7, %v1519_v10 }
  0x71   : > { %vm759_vm14 = vmor %vm662_vm11, %vm711_vm13 }
  0x72   : > { %1233 = vmatpush.msk.msrb.mxu0 %vm759_vm14, %v1402_v19  ;;  %vm641_vm1 = vmor %vm544_vm10, %vm593_vm9  ;;  %1255 = vmatpush.msk.msrb.mxu1 %vm759_vm14, %v1402_v19  ;;  %vm562_vm10 = vcmp.eq.s32.totalorder %v513_v13, %v1513_v6  ;;  %vm611_vm9 = vcmp.eq.s32.totalorder %v513_v13, %v1517_v9  ;;  %vm708_vm14 = vcmp.eq.s32.totalorder %v513_v13, %v1519_v10 }
  0x73   : > { %vm738_vm6 = vmor %vm641_vm1, %vm690_vm3  ;;  %vm610_vm1 = vcmp.eq.s32.totalorder %v512_v14, %v1517_v9 }
  0x74   : > { %1222 = vmatpush.msk.msra.mxu3 %vm738_vm6, %v1402_v19  ;;  %vm661_vm13 = vmor %vm564_vm2, %vm613_vm4  ;;  %vm561_vm4 = vcmp.eq.s32.totalorder %v512_v14, %v1513_v6  ;;  %vm707_vm6 = vcmp.eq.s32.totalorder %v512_v14, %v1519_v10 }
  0x75   : > { %vm758_vm11 = vmor %vm661_vm13, %vm710_vm15  ;;  %vm609_vm13 = vcmp.eq.s32.totalorder %v511_v15, %v1517_v9  ;;  %v880_v9 = vld [vmem:[%s1924_s5 + $0x10] sm:$0xff] }
  0x76   : > { %1234 = vmatpush.msk.msrb.mxu0 %vm758_vm11, %v1402_v19  ;;  %vm660_vm3 = vmor %vm563_vm7, %vm612_vm12  ;;  %1256 = vmatpush.msk.msrb.mxu1 %vm758_vm11, %v1402_v19  ;;  %vm560_vm12 = vcmp.eq.s32.totalorder %v511_v15, %v1513_v6  ;;  %vm706_vm11 = vcmp.eq.s32.totalorder %v511_v15, %v1519_v10  ;;  %v868_v6 = vld [vmem:[#allocation2 + $0x10] sm:$0xff] }
  0x77   : > { %vm757_vm2 = vmor %vm660_vm3, %vm709_vm8  ;;  %894 = vperm.xlu0 %1319, %v880_v9  }
  0x78   : > { %1235 = vmatpush.msk.msrb.mxu0 %vm757_vm2, %v1402_v19  ;;  %vm659_vm15 = vmor %vm562_vm10, %vm611_vm9  ;;  %1257 = vmatpush.msk.msrb.mxu1 %vm757_vm2, %v1402_v19 }
  0x79   : > { %vm756_vm7 = vmor %vm659_vm15, %vm708_vm14 }
  0x7a   : > { %1236 = vmatpush.msk.msrb.mxu0 %vm756_vm7, %v1402_v19  ;;  %vm658_vm8 = vmor %vm561_vm4, %vm610_vm1  ;;  %1258 = vmatpush.msk.msrb.mxu1 %vm756_vm7, %v1402_v19 }
  0x7b   : > { %vm755_vm10 = vmor %vm658_vm8, %vm707_vm6 }
  0x7c   : > { %1237 = vmatpush.msk.msrb.mxu0 %vm755_vm10, %v1402_v19  ;;  %vm657_vm9 = vmor %vm560_vm12, %vm609_vm13  ;;  %1259 = vmatpush.msk.msrb.mxu1 %vm755_vm10, %v1402_v19 }
  0x7d   : > { %vm754_vm3 = vmor %vm657_vm9, %vm706_vm11 }
  0x7e   : > { %1238 = vmatpush.msk.msrb.mxu0 %vm754_vm3, %v1402_v19  ;;  %1260 = vmatpush.msk.msrb.mxu1 %vm754_vm3, %v1402_v19 }
  0x7f   : > { %976 = vmatmul.f32.vlgmr.msrb.gmra.mxu0 %v868_v6  ;;  %985 = vmatmul.f32.vlgmr.msrb.gmra.mxu1 %v877_v23 }
  0x87   : > { %979 = vmatmul.f32.gmra.mxu0 %v871_v24 }
  0x8f   : > { %982 = vmatmul.f32.gmra.mxu0 %v874_v29 }
  0x97   : > { %v998_v5 = vpop.permute.xlu2 %997 }
  0x9d   : > { %v400_v16 = vpop.f32.mrf.mxu0  ;;  %v450_v17 = vpop.f32.mrf.mxu1 }
  0x9e   : > { %413 = vst.msk [vmem:[#allocation2] sm:$0xff] %vm412_vm0, %v400_v16 }
  0x9f   : > { %462 = vst.msk [vmem:[#allocation2 + $0x8] sm:$0xff] %vm412_vm0, %v450_v17  ;;  %v890_v42 = vpop.permute.xlu1 %889 }
  0xa5   : > { %v403_v20 = vpop.f32.mrf.mxu0  ;;  %v866_v21 = vld [vmem:[#allocation2] sm:$0xff]  ;;  %v453_v22 = vpop.f32.mrf.mxu1 }
  0xa6   : > { %414 = vst.msk [vmem:[#allocation2 + $0x18] sm:$0xff] %vm412_vm0, %v403_v20  ;;  %918 = vmatmul.f32.vlgmr.msra.gmra.mxu2 %v866_v21  ;;  %v867_v10 = vld [vmem:[#allocation2 + $0x8] sm:$0xff] }
  0xa7   : > { %463 = vst.msk [vmem:[#allocation2 + $0x20] sm:$0xff] %vm412_vm0, %v453_v22  ;;  %947 = vmatmul.f32.vlgmr.msra.gmra.mxu3 %v867_v10  ;;  %v885_v48 = vpop.permute.xlu1 %884 }
  0xad   : > { %v406_v25 = vpop.f32.mrf.mxu0  ;;  %v869_v26 = vld [vmem:[#allocation2 + $0x18] sm:$0xff]  ;;  %v456_v27 = vpop.f32.mrf.mxu1 }
  0xae   : > { %415 = vst.msk [vmem:[#allocation2 + $0x30] sm:$0xff] %vm412_vm0, %v406_v25  ;;  %921 = vmatmul.f32.gmra.mxu2 %v869_v26  ;;  %v870_v28 = vld [vmem:[#allocation2 + $0x20] sm:$0xff] }
  0xaf   : > { %464 = vst.msk [vmem:[#allocation2 + $0x38] sm:$0xff] %vm412_vm0, %v456_v27  ;;  %950 = vmatmul.f32.gmra.mxu3 %v870_v28 }
  0xb5   : > { %v409_v30 = vpop.f32.mrf.mxu0  ;;  %v872_v31 = vld [vmem:[#allocation2 + $0x30] sm:$0xff]  ;;  %v459_v32 = vpop.f32.mrf.mxu1 }
  0xb6   : > { %416 = vst.msk [vmem:[#allocation2 + $0x48] sm:$0xff] %vm412_vm0, %v409_v30  ;;  %924 = vmatmul.f32.gmra.mxu2 %v872_v31  ;;  %v873_v19 = vld [vmem:[#allocation2 + $0x38] sm:$0xff] }
  0xb7   : > { %465 = vst.msk [vmem:[#allocation2 + $0x50] sm:$0xff] %vm412_vm0, %v459_v32  ;;  %953 = vmatmul.f32.gmra.mxu3 %v873_v19  ;;  %vm1024_vm0 = vcmask 64512  }
  0xbd   : > { %v875_v33 = vld [vmem:[#allocation2 + $0x48] sm:$0xff] }
  0xbe   : > { %927 = vmatmul.f32.gmra.mxu2 %v875_v33  ;;  %v876_v34 = vld [vmem:[#allocation2 + $0x50] sm:$0xff] }
  0xbf   : > { %956 = vmatmul.f32.gmra.mxu3 %v876_v34 }
  0xda   : > { %v900_v38 = vpop.permute.xlu0 %899 }
  0xe9   : > { %v895_v46 = vpop.permute.xlu0 %894 }
  0xfc   : > { %v977_v37 = vpop.f32.mrf.mxu0  ;;  %v986_v56 = vpop.f32.mrf.mxu1 }
 0x104   : > { %v980_v43 = vpop.f32.mrf.mxu0 }
 0x10c   : > { %v983_v55 = vpop.f32.mrf.mxu0 }
 0x129   : > { %v919_v35 = vpop.f32.mrf.mxu2 }
 0x12a   : > { %v948_v36 = vpop.f32.mrf.mxu3  ;;  %v920_v51 = vadd.f32 %v919_v35, %v885_v48 }
 0x12c   : > { %v949_v59 = vadd.f32 %v948_v36, %v920_v51 }
 0x12e   : > { %v978_v0 = vadd.f32 %v977_v37, %v949_v59 }
 0x130   : > { %v989_v3 = vmax.f32 %v978_v0, 0.0 }
 0x131   : > { %v922_v39 = vpop.f32.mrf.mxu2 }
 0x132   : > { %v951_v41 = vpop.f32.mrf.mxu3  ;;  %v923_v49 = vadd.f32 %v922_v39, %v890_v42 }
 0x134   : > { %v952_v57 = vadd.f32 %v951_v41, %v923_v49 }
 0x136   : > { %v981_v62 = vadd.f32 %v980_v43, %v952_v57 }
 0x138   : > { %v990_v2 = vmax.f32 %v981_v62, 0.0 }
 0x139   : > { %v925_v44 = vpop.f32.mrf.mxu2 }
 0x13a   : > { %v954_v45 = vpop.f32.mrf.mxu3  ;;  %v926_v47 = vadd.f32 %v925_v44, %v895_v46 }
 0x13c   : > { %v955_v52 = vadd.f32 %v954_v45, %v926_v47 }
 0x13e   : > { %v984_v60 = vadd.f32 %v983_v55, %v955_v52 }
 0x140   : > { %v991_v1 = vmax.f32 %v984_v60, 0.0 }
 0x141   : > { %v928_v50 = vpop.f32.mrf.mxu2 }
 0x142   : > { %v929_v53 = vadd.f32 %v928_v50, %v900_v38  ;;  %v957_v54 = vpop.f32.mrf.mxu3 }
 0x144   : > { %v958_v58 = vadd.f32 %v957_v54, %v929_v53 }
 0x146   : > { %v987_v61 = vadd.f32 %v986_v56, %v958_v58 }
 0x148   : > { %v992_v63 = vmax.f32 %v987_v61, 0.0 }
 0x14a   : > { %1016 = vmatpush.msra.mxu1 %v992_v63 }
 0x14c   : > { %1017 = vmatpush.msra.mxu1 %v991_v1 }
 0x14e   : > { %1018 = vmatpush.msra.mxu1 %v990_v2 }
 0x150   : > { %1019 = vmatpush.msra.mxu1 %v989_v3 }
 0x151   : > { %1239 = vmatmul.msk.f32.vlgmr.msra.gmra.mxu1 %vm1933_vm5, %v993_v4 }
 0x1ce   : > { %v1021_v7 = vpop.f32.mrf.mxu1 }
 0x1cf   : > { %v1022_v11 = vadd.f32 %v1021_v7, %v998_v5 }
 0x1d1   : > { %1025 = vst.msk [vmem:[%s333_s22] sm:$0xff] %vm1024_vm0, %v1022_v11 }
 0x1d2   : > { %1349 = shalt.err (!%p1346_p5)
}
 0x1d3   : > { %1261 = dma.vmem_to_hbm [thread:$0]  (%p1490_p4), %s1041_s23, 128, %s1043_s24, %s1027_s25  }
 0x1d4 PF: > { %p1267_p6 = scmp.ge.s32.totalorder %s1400_s10, 2  ;;  %s1054_s12 = sand.u32 1, %s1380_s27  }
 0x1d5   : > { %s1055_s21 = scalar_lea.sflag [#allocation4], %s1054_s12 }
 0x1d6   : > { %p1264_p7 = pnand %p1267_p6, %p1497_p8 }
 0x1d8   : > { %p1265_p9 = pneg %p1264_p7 }
 0x1da   : > { %1375 = dma.done.wait (%p1265_p9), %s1055_s21, 128  }
 0x1db   : > { %1377 = vsyncadd (%p1265_p9), %s1055_s21, 4294967168  ;;  %s21_s10 = sadd.s32 1, %s1400_s10   ;;  %s1934_s27 = smov %s1384_s28 }
 0x1dc   : > { %p18_p10 = scmp.ge.s32.totalorder %s21_s10, 4   ;;  %s1935_s28 = smov %s1388_s29 }
 0x1dd   : > { %s1936_s29 = smov %s1503_s18  ;;  %s1937_s30 = smov %s1396_s9 }
 0x1de   : > { %s1938_s9 = smov %s1940_s13  ;;  %20 = sbr.rel (!%p18_p10) target bundleno = 4 (0x4), region = 94 }
 0x1e3   :  { %1061 = vsyncpa [#allocation4], 1 }
 0x1e4   :  { %1063 = vsyncpa [#allocation4 + $0x1], 1 }

// kernel: tpu_custom_call.1
= control target key start
LH: loop header
LB: loop body
LE: loop exit
PB: predicated region body
PF: predicated region fallthrough
CT: control target
= control target key end

     0   :  { %13 = vsyncpa [#allocation4], 0  ;;  %s1919_s0 = inlined_call_operand.vmem [shape: f32[2,32,16], index: 0, kind: input, shape index: {}]   ;;  %s1920_s1 = inlined_call_operand.vmem [shape: s32[2,3,8], index: 1, kind: input, shape index: {}]   ;;  %s1921_s2 = inlined_call_operand.vmem [shape: f32[32,32], index: 2, kind: input, shape index: {}]   ;;  %s1922_s3 = inlined_call_operand.vmem [shape: f32[32,32], index: 3, kind: input, shape index: {}]   ;;  %s1923_s4 = inlined_call_operand.vmem [shape: f32[32,5], index: 4, kind: input, shape index: {}]   ;;  %s1924_s5 = inlined_call_operand.vmem [shape: f32[32,1], index: 5, kind: input, shape index: {}]   ;;  %s1925_s6 = inlined_call_operand.vmem [shape: f32[8,32], index: 6, kind: input, shape index: {}]   ;;  %s1926_s7 = inlined_call_operand.vmem [shape: f32[8,1], index: 7, kind: input, shape index: {}]   ;;  %s1927_s8 = inlined_call_operand.hbm [shape: f32[2,8,8], index: 8, kind: output, shape index: {}]  }
   0x1   :  { %15 = vsyncpa [#allocation4 + $0x1], 0  ;;  %s1450_s27 = smov 0   ;;  %s1452_s28 = smov 0  }
   0x2   :  { %s1454_s29 = smov 0   ;;  %s1456_s30 = smov 0  }
   0x3   :  { %s1458_s9 = smov 0   ;;  %s1460_s10 = smov 0  }
   0x4 LB: > { %s1126_s11 = sadd.s32 4294967295, %s1400_s10   ;;  %s1127_s12 = sadd.s32 4294967294, %s1400_s10   ;;  %s1400_s10 = sphi %s1460_s10, %s21_s10   ;;  %s1396_s9 = sphi %s1458_s9, %s1938_s9   ;;  %s1392_s30 = sphi %s1456_s30, %s1937_s30   ;;  %s1388_s29 = sphi %s1454_s29, %s1936_s29   ;;  %s1384_s28 = sphi %s1452_s28, %s1935_s28   ;;  %s1380_s27 = sphi %s1450_s27, %s1934_s27  }
   0x5   : > { %s33_s13 = sadd.s32 1, %s1396_s9  ;;  %s222_s14 = sadd.s32 1, %s1388_s29 }
   0x6   : > { %p35_p0 = scmp.ge.s32.totalorder %s33_s13, 2  ;;  %p232_p1 = scmp.ne.s32.totalorder %s1388_s29, %s1384_s28 }
   0x7   : > { %p233_p2 = scmp.eq.s32.totalorder %s1126_s11, 1  ;;  %p238_p3 = scmp.ne.s32.totalorder %s1384_s28, %s1380_s27 }
   0x8   : > { %s1940_s13 = smov (%p35_p0, %s33_s13), 0  ;;  %p239_p5 = scmp.eq.s32.totalorder %s1127_s12, 1 }
   0x9   : > { %p1490_p4 = por %p233_p2, %p232_p1  ;;  %s217_s16 = ssub.s32 %s1396_s9, %s1940_s13 }
   0xa   : > { %p1130_p6 = scmp.ge.s32.totalorder %s1400_s10, 1  ;;  %p220_p7 = scmp.eq.s32.totalorder %s217_s16, 0 }
   0xb   : > { %p1497_p8 = por %p239_p5, %p238_p3  ;;  %p293_p9 = scmp.lt.s32.totalorder %s1400_s10, 3 }
   0xc   : > { %s1503_s18 = scalar_select %p220_p7, %s1388_s29, %s222_s14  }
   0xd   : > { %p294_p10 = pnand %p1130_p6, %p293_p9 }
   0xe   : > { %p334_p11 = scmp.lt.s32.totalorder (!%p294_p10), %s1392_s30, 1  ;;  %s331_s12 = sand.u32 (!%p294_p10), 1, %s1384_s28  }
   0xf   : > { %297 = sbr.rel (%p294_p10) target bundleno = 468 (0x1d4), region = 52  ;;  %s1131_s14 = sshll.u32 (!%p294_p10), %s331_s12, 3 }
  0x10   : > { %s1241_s16 = sshll.u32 (!%p294_p10), %s1392_s30, 3  ;;  %s333_s22 = scalar_lea.vmem (!%p294_p10), [#allocation3], %s1131_s14 }
  0x11   : > { %s1040_s23 = sshll.u32 (!%p294_p10), %s333_s22, 4  ;;  %s1027_s25 = scalar_lea.sflag (!%p294_p10), [#allocation4], %s331_s12  ;;  %s1041_s23 = int_to_ptr.vmem [resolvable:$true] %s1040_s23 }
  0x12   : > { %s1342_s14 = scalar_lea.hbm (!%p294_p10), %s1927_s8, 16 }
  0x14   : > { %s335_s19 = scalar_select %p334_p11, %s1392_s30, 1  ;;  %v478_v3 = vlaneseq  ;;  %v366_v15 = vld [vmem:[%s1921_s2] sm:$0xff]  ;;  %vm1928_vm0 = vcmask 261120   ;;  %v1402_v19 = vmov 1.0   ;;  %v367_v22 = vld [vmem:[%s1921_s2 + $0x8] sm:$0xff]  ;;  %v368_v28 = vld [vmem:[%s1921_s2 + $0x10] sm:$0xff] }
  0x15   : > { %v417_v16 = vld [vmem:[%s1922_s3] sm:$0xff]  ;;  %v418_v23 = vld [vmem:[%s1922_s3 + $0x8] sm:$0xff]  ;;  %v419_v29 = vld [vmem:[%s1922_s3 + $0x10] sm:$0xff]  ;;  %v1403_v39 = vmov 0.0  }
  0x16   : > { %s1244_s20 = sshll.u32 %s335_s19, 5  ;;  %s1134_s21 = sshll.u32 %s335_s19, 2  ;;  %v1515_v8 = vshrl.u32 %v478_v3, 7  ;;  %v369_v34 = vld [vmem:[%s1921_s2 + $0x18] sm:$0xff]  ;;  %350 = vst [vmem:[#allocation2] sm:$0xff] %v1403_v39  ;;  %v466_v60 = vld [vmem:[%s1923_s4] sm:$0xff] }
  0x17   : > { %s338_s24 = scalar_lea.vmem %s1919_s0, %s1244_s20  ;;  %s345_s11 = scalar_lea.vmem %s1920_s1, %s1134_s21  ;;  %v420_v35 = vld [vmem:[%s1922_s3 + $0x18] sm:$0xff]  ;;  %351 = vst [vmem:[#allocation2 + $0x8] sm:$0xff] %v1403_v39 }
  0x18   : > { %v365_v0 = vld [vmem:[%s338_s24 + $0x18] sm:$0xff]  ;;  %v475_v1 = vld [vmem:[%s345_s11] sm:$0x7]  ;;  %v364_v2 = vld [vmem:[%s338_s24 + $0x10] sm:$0xff]  ;;  %v494_v12 = vadd.s32 120, %v1515_v8  ;;  %v493_v13 = vadd.s32 112, %v1515_v8  ;;  %s1038_s21 = scalar_lea.hbm %s1927_s8, %s1241_s16 }
  0x19   : > { %395 = vmatpush.msra.mxu0 %v365_v0  ;;  %v476_v4 = vadd.s32 128, %v475_v1  ;;  %v477_v5 = vadd.s32 256, %v475_v1  ;;  %445 = vmatpush.msra.mxu1 %v365_v0  ;;  %v1513_v6 = vperm.slane %v475_v1, 0  ;;  %v363_v7 = vld [vmem:[%s338_s24 + $0x8] sm:$0xff]  ;;  %v362_v11 = vld [vmem:[%s338_s24] sm:$0xff]  ;;  %v510_v14 = vadd.s32 248, %v1515_v8 }
  0x1a   : > { %v492_v17 = vadd.s32 104, %v1515_v8  ;;  %v509_v18 = vadd.s32 240, %v1515_v8  ;;  %v491_v20 = vadd.s32 96, %v1515_v8  ;;  %v508_v21 = vadd.s32 232, %v1515_v8  ;;  %352 = vst [vmem:[#allocation2 + $0x10] sm:$0xff] %v1403_v39  ;;  %v879_v1 = vld [vmem:[%s1924_s5 + $0x8] sm:$0xff] }
  0x1b   : > { %v1517_v9 = vperm.slane %v476_v4, 1  ;;  %v1519_v10 = vperm.slane %v477_v5, 2  ;;  %396 = vmatpush.msra.mxu0 %v364_v2  ;;  %446 = vmatpush.msra.mxu1 %v364_v2  ;;  %vm543_vm1 = vcmp.eq.s32.totalorder %v494_v12, %v1513_v6  ;;  %vm542_vm4 = vcmp.eq.s32.totalorder %v493_v13, %v1513_v6  ;;  %353 = vst [vmem:[#allocation2 + $0x18] sm:$0xff] %v1403_v39  ;;  %v467_v2 = vld [vmem:[%s1923_s4 + $0x8] sm:$0xff]  ;;  %s1042_s24 = sshll.u32 %s1038_s21, 4  ;;  %s1043_s24 = int_to_ptr.hbm [resolvable:$true] %s1042_s24 }
  0x1c   : > { %vm559_vm9 = vcmp.eq.s32.totalorder %v510_v14, %v1513_v6  ;;  %vm541_vm14 = vcmp.eq.s32.totalorder %v492_v17, %v1513_v6  ;;  %v490_v24 = vadd.s32 88, %v1515_v8  ;;  %v507_v25 = vadd.s32 224, %v1515_v8  ;;  %354 = vst [vmem:[#allocation2 + $0x20] sm:$0xff] %v1403_v39  ;;  %s1336_s26 = sshra.s32 %s1043_s24, 4  ;;  %s1337_s26 = int_to_ptr.hbm [resolvable:$true] %s1336_s26 }
  0x1d   : > { %397 = vmatpush.msra.mxu0 %v363_v7  ;;  %447 = vmatpush.msra.mxu1 %v363_v7  ;;  %vm592_vm2 = vcmp.eq.s32.totalorder %v494_v12, %v1517_v9  ;;  %vm689_vm3 = vcmp.eq.s32.totalorder %v494_v12, %v1519_v10  ;;  %vm591_vm6 = vcmp.eq.s32.totalorder %v493_v13, %v1517_v9  ;;  %v489_v26 = vadd.s32 80, %v1515_v8  ;;  %v468_v12 = vld [vmem:[%s1923_s4 + $0x10] sm:$0xff]  ;;  %s1338_s11 = scalar_lea.hbm %s1337_s26, 8  ;;  %p1343_p1 = scmp.lt.s32.totalorder %s1337_s26, %s1927_s8 }
  0x1e   : > { %vm640_vm5 = vmor %vm543_vm1, %vm592_vm2  ;;  %vm688_vm7 = vcmp.eq.s32.totalorder %v493_v13, %v1519_v10  ;;  %vm608_vm10 = vcmp.eq.s32.totalorder %v510_v14, %v1517_v9  ;;  %vm705_vm12 = vcmp.eq.s32.totalorder %v510_v14, %v1519_v10  ;;  %vm590_vm15 = vcmp.eq.s32.totalorder %v492_v17, %v1517_v9  ;;  %355 = vst [vmem:[#allocation2 + $0x28] sm:$0xff] %v1403_v39  ;;  %p1339_p12 = scmp.ne.s32.totalorder %s1337_s26, %s1338_s11  ;;  %p1344_p2 = scmp.lt.s32.totalorder %s1342_s14, %s1338_s11 }
  0x1f   : > { %398 = vmatpush.msra.mxu0 %v362_v11  ;;  %448 = vmatpush.msra.mxu1 %v362_v11  ;;  %vm737_vm8 = vmor %vm640_vm5, %vm689_vm3  ;;  %vm687_vm2 = vcmp.eq.s32.totalorder %v492_v17, %v1519_v10  ;;  %vm558_vm5 = vcmp.eq.s32.totalorder %v509_v18, %v1513_v6  ;;  %v506_v27 = vadd.s32 216, %v1515_v8  ;;  %v526_v30 = vadd.s32 376, %v1515_v8  ;;  %356 = vst [vmem:[#allocation2 + $0x30] sm:$0xff] %v1403_v39  ;;  %v878_v11 = vld [vmem:[%s1924_s5] sm:$0xff] }
  0x20   : > { %1135 = vmatmul.msk.f32.vlgmr.msra.gmra.mxu0 %vm1928_vm0, %v366_v15  ;;  %1139 = vmatmul.msk.f32.vlgmr.msra.gmra.mxu1 %vm1928_vm0, %v417_v16  ;;  %vm639_vm11 = vmor %vm542_vm4, %vm591_vm6  ;;  %vm704_vm6 = vcmp.eq.s32.totalorder %v509_v18, %v1519_v10  ;;  %v488_v31 = vadd.s32 72, %v1515_v8  ;;  %v505_v32 = vadd.s32 208, %v1515_v8  ;;  %v525_v33 = vadd.s32 368, %v1515_v8  ;;  %357 = vst [vmem:[#allocation2 + $0x38] sm:$0xff] %v1403_v39  ;;  %p1340_p13 = pnand %p1339_p12, %p1490_p4  ;;  %p1345_p3 = por %p1344_p2, %p1343_p1 }
  0x21   : > { %1191 = vmatpush.msk.msra.mxu2 %vm737_vm8, %v1402_v19  ;;  %vm736_vm13 = vmor %vm639_vm11, %vm688_vm7  ;;  %vm607_vm8 = vcmp.eq.s32.totalorder %v509_v18, %v1517_v9  ;;  %v487_v37 = vadd.s32 64, %v1515_v8  ;;  %v504_v38 = vadd.s32 200, %v1515_v8  ;;  %v524_v40 = vadd.s32 360, %v1515_v8  ;;  %358 = vst [vmem:[#allocation2 + $0x40] sm:$0xff] %v1403_v39  ;;  %v469_v18 = vld [vmem:[%s1923_s4 + $0x18] sm:$0xff] }
  0x22   : > { %vm656_vm1 = vmor %vm559_vm9, %vm608_vm10  ;;  %vm540_vm9 = vcmp.eq.s32.totalorder %v491_v20, %v1513_v6  ;;  %vm589_vm10 = vcmp.eq.s32.totalorder %v491_v20, %v1517_v9  ;;  %v486_v41 = vadd.s32 56, %v1515_v8  ;;  %v503_v42 = vadd.s32 192, %v1515_v8  ;;  %359 = vst [vmem:[#allocation2 + $0x48] sm:$0xff] %v1403_v39  ;;  %p1341_p0 = pneg %p1340_p13 }
  0x23   : > { %1192 = vmatpush.msk.msra.mxu2 %vm736_vm13, %v1402_v19  ;;  %vm753_vm3 = vmor %vm656_vm1, %vm705_vm12  ;;  %vm686_vm12 = vcmp.eq.s32.totalorder %v491_v20, %v1519_v10  ;;  %v523_v43 = vadd.s32 352, %v1515_v8  ;;  %v485_v44 = vadd.s32 48, %v1515_v8  ;;  %360 = vst [vmem:[#allocation2 + $0x50] sm:$0xff] %v1403_v39  ;;  %v502_v45 = vadd.s32 184, %v1515_v8 }
  0x24   : > { %1207 = vmatpush.msk.msra.mxu3 %vm753_vm3, %v1402_v19  ;;  %vm638_vm4 = vmor %vm541_vm14, %vm590_vm15  ;;  %vm557_vm14 = vcmp.eq.s32.totalorder %v508_v21, %v1513_v6  ;;  %vm606_vm15 = vcmp.eq.s32.totalorder %v508_v21, %v1517_v9  ;;  %361 = vst [vmem:[#allocation2 + $0x58] sm:$0xff] %v1403_v39  ;;  %v522_v46 = vadd.s32 344, %v1515_v8  ;;  %v484_v47 = vadd.s32 40, %v1515_v8  ;;  %p1346_p5 = pnand %p1345_p3, %p1341_p0 }
  0x25   : > { %vm735_vm7 = vmor %vm638_vm4, %vm687_vm2  ;;  %vm703_vm2 = vcmp.eq.s32.totalorder %v508_v21, %v1519_v10  ;;  %v501_v48 = vadd.s32 176, %v1515_v8  ;;  %v521_v49 = vadd.s32 336, %v1515_v8  ;;  %v483_v50 = vadd.s32 32, %v1515_v8 }
  0x26   : > { %1193 = vmatpush.msk.msra.mxu2 %vm735_vm7, %v1402_v19  ;;  %vm655_vm11 = vmor %vm558_vm5, %vm607_vm8  ;;  %vm539_vm5 = vcmp.eq.s32.totalorder %v490_v24, %v1513_v6  ;;  %vm588_vm8 = vcmp.eq.s32.totalorder %v490_v24, %v1517_v9  ;;  %v500_v51 = vadd.s32 168, %v1515_v8  ;;  %v520_v52 = vadd.s32 328, %v1515_v8 }
  0x27   : > { %vm752_vm13 = vmor %vm655_vm11, %vm704_vm6  ;;  %vm685_vm6 = vcmp.eq.s32.totalorder %v490_v24, %v1519_v10  ;;  %vm556_vm11 = vcmp.eq.s32.totalorder %v507_v25, %v1513_v6  ;;  %v482_v53 = vadd.s32 24, %v1515_v8  ;;  %v499_v54 = vadd.s32 160, %v1515_v8 }
  0x28   : > { %1136 = vmatmul.msk.f32.gmra.mxu0 %vm1928_vm0, %v367_v22  ;;  %1140 = vmatmul.msk.f32.gmra.mxu1 %vm1928_vm0, %v418_v23  ;;  %vm637_vm1 = vmor %vm540_vm9, %vm589_vm10  ;;  %vm702_vm10 = vcmp.eq.s32.totalorder %v507_v25, %v1519_v10  ;;  %v519_v55 = vadd.s32 320, %v1515_v8  ;;  %v481_v56 = vadd.s32 16, %v1515_v8  ;;  %v498_v57 = vadd.s32 152, %v1515_v8 }
  0x29   : > { %1208 = vmatpush.msk.msra.mxu3 %vm752_vm13, %v1402_v19  ;;  %vm734_vm3 = vmor %vm637_vm1, %vm686_vm12  ;;  %vm605_vm13 = vcmp.eq.s32.totalorder %v507_v25, %v1517_v9  ;;  %v518_v58 = vadd.s32 312, %v1515_v8  ;;  %v480_v59 = vadd.s32 8, %v1515_v8  ;;  %v497_v61 = vadd.s32 144, %v1515_v8 }
  0x2a   : > { %1194 = vmatpush.msk.msra.mxu2 %vm734_vm3, %v1402_v19  ;;  %vm654_vm4 = vmor %vm557_vm14, %vm606_vm15  ;;  %vm538_vm14 = vcmp.eq.s32.totalorder %v489_v26, %v1513_v6  ;;  %vm587_vm15 = vcmp.eq.s32.totalorder %v489_v26, %v1517_v9  ;;  %v517_v62 = vadd.s32 304, %v1515_v8  ;;  %v496_v63 = vadd.s32 136, %v1515_v8 }
  0x2b   : > { %vm751_vm7 = vmor %vm654_vm4, %vm703_vm2  ;;  %vm684_vm2 = vcmp.eq.s32.totalorder %v489_v26, %v1519_v10  ;;  %v1404_v0 = vmov 0   ;;  %v516_v3 = vadd.s32 296, %v1515_v8  ;;  %v495_v4 = vadd.s32 128, %v1515_v8 }
  0x2c   : > { %1209 = vmatpush.msk.msra.mxu3 %vm751_vm7, %v1402_v19  ;;  %vm636_vm9 = vmor %vm539_vm5, %vm588_vm8  ;;  %vm555_vm5 = vcmp.eq.s32.totalorder %v506_v27, %v1513_v6  ;;  %vm604_vm8 = vcmp.eq.s32.totalorder %v506_v27, %v1517_v9  ;;  %1320 = vset.pattern.permute.xlu1 %v1404_v0  ;;  %v515_v5 = vadd.s32 288, %v1515_v8  ;;  %v514_v7 = vadd.s32 280, %v1515_v8 }
  0x2d   : > { %vm733_vm12 = vmor %vm636_vm9, %vm685_vm6  ;;  %vm701_vm6 = vcmp.eq.s32.totalorder %v506_v27, %v1519_v10  ;;  %889 = vperm.xlu1 %1320, %v879_v1   ;;  %1319 = vset.pattern.permute.xlu0 %v1404_v0  ;;  %v513_v13 = vadd.s32 272, %v1515_v8  ;;  %v512_v14 = vadd.s32 264, %v1515_v8  ;;  %v511_v15 = vadd.s32 256, %v1515_v8 }
  0x2e   : > { %1195 = vmatpush.msk.msra.mxu2 %vm733_vm12, %v1402_v19  ;;  %vm653_vm1 = vmor %vm556_vm11, %vm605_vm13  ;;  %vm575_vm11 = vcmp.eq.s32.totalorder %v526_v30, %v1513_v6  ;;  %vm624_vm13 = vcmp.eq.s32.totalorder %v526_v30, %v1517_v9  ;;  %1321 = vset.pattern.permute.xlu2 %v1404_v0 }
  0x2f   : > { %vm750_vm3 = vmor %vm653_vm1, %vm702_vm10  ;;  %vm721_vm10 = vcmp.eq.s32.totalorder %v526_v30, %v1519_v10  ;;  %vm537_vm1 = vcmp.eq.s32.totalorder %v488_v31, %v1513_v6 }
  0x30   : > { %1137 = vmatmul.msk.f32.gmra.mxu0 %vm1928_vm0, %v368_v28  ;;  %1141 = vmatmul.msk.f32.gmra.mxu1 %vm1928_vm0, %v419_v29  ;;  %vm635_vm4 = vmor %vm538_vm14, %vm587_vm15  ;;  %vm683_vm15 = vcmp.eq.s32.totalorder %v488_v31, %v1519_v10 }
  0x31   : > { %1210 = vmatpush.msk.msra.mxu3 %vm750_vm3, %v1402_v19  ;;  %vm732_vm7 = vmor %vm635_vm4, %vm684_vm2  ;;  %vm586_vm3 = vcmp.eq.s32.totalorder %v488_v31, %v1517_v9 }
  0x32   : > { %1196 = vmatpush.msk.msra.mxu2 %vm732_vm7, %v1402_v19  ;;  %vm652_vm9 = vmor %vm555_vm5, %vm604_vm8  ;;  %vm554_vm5 = vcmp.eq.s32.totalorder %v505_v32, %v1513_v6  ;;  %vm603_vm8 = vcmp.eq.s32.totalorder %v505_v32, %v1517_v9 }
  0x33   : > { %vm749_vm12 = vmor %vm652_vm9, %vm701_vm6  ;;  %vm700_vm6 = vcmp.eq.s32.totalorder %v505_v32, %v1519_v10 }
  0x34   : > { %1211 = vmatpush.msk.msra.mxu3 %vm749_vm12, %v1402_v19  ;;  %vm672_vm14 = vmor %vm575_vm11, %vm624_vm13  ;;  %vm574_vm11 = vcmp.eq.s32.totalorder %v525_v33, %v1513_v6  ;;  %vm623_vm13 = vcmp.eq.s32.totalorder %v525_v33, %v1517_v9 }
  0x35   : > { %vm1616_vm2 = vmor %vm672_vm14, %vm721_vm10  ;;  %vm720_vm10 = vcmp.eq.s32.totalorder %v525_v33, %v1519_v10  ;;  %884 = vperm.xlu1 %1320, %v878_v11  }
  0x36   : > { %1223 = vmatpush.msk.msrb.mxu0 %vm1616_vm2, %v1402_v19  ;;  %vm634_vm4 = vmor %vm537_vm1, %vm586_vm3  ;;  %1245 = vmatpush.msk.msrb.mxu1 %vm1616_vm2, %v1402_v19  ;;  %vm536_vm1 = vcmp.eq.s32.totalorder %v487_v37, %v1513_v6  ;;  %vm585_vm3 = vcmp.eq.s32.totalorder %v487_v37, %v1517_v9  ;;  %vm553_vm2 = vcmp.eq.s32.totalorder %v504_v38, %v1513_v6 }
  0x37   : > { %vm731_vm7 = vmor %vm634_vm4, %vm683_vm15  ;;  %vm682_vm15 = vcmp.eq.s32.totalorder %v487_v37, %v1519_v10 }
  0x38   : > { %1138 = vmatmul.msk.f32.gmra.mxu0 %vm1928_vm0, %v369_v34  ;;  %1142 = vmatmul.msk.f32.gmra.mxu1 %vm1928_vm0, %v420_v35  ;;  %vm651_vm9 = vmor %vm554_vm5, %vm603_vm8  ;;  %vm602_vm8 = vcmp.eq.s32.totalorder %v504_v38, %v1517_v9 }
  0x39   : > { %1197 = vmatpush.msk.msra.mxu2 %vm731_vm7, %v1402_v19  ;;  %vm748_vm12 = vmor %vm651_vm9, %vm700_vm6  ;;  %vm699_vm6 = vcmp.eq.s32.totalorder %v504_v38, %v1519_v10 }
  0x3a   : > { %1212 = vmatpush.msk.msra.mxu3 %vm748_vm12, %v1402_v19  ;;  %vm671_vm14 = vmor %vm574_vm11, %vm623_vm13  ;;  %vm573_vm11 = vcmp.eq.s32.totalorder %v524_v40, %v1513_v6  ;;  %vm622_vm13 = vcmp.eq.s32.totalorder %v524_v40, %v1517_v9 }
  0x3b   : > { %vm768_vm5 = vmor %vm671_vm14, %vm720_vm10  ;;  %vm719_vm10 = vcmp.eq.s32.totalorder %v524_v40, %v1519_v10  ;;  %v994_v40 = vld [vmem:[%s1926_s7] sm:$0xff] }
  0x3c   : > { %1224 = vmatpush.msk.msrb.mxu0 %vm768_vm5, %v1402_v19  ;;  %vm633_vm4 = vmor %vm536_vm1, %vm585_vm3  ;;  %1246 = vmatpush.msk.msrb.mxu1 %vm768_vm5, %v1402_v19  ;;  %vm535_vm1 = vcmp.eq.s32.totalorder %v486_v41, %v1513_v6  ;;  %vm584_vm3 = vcmp.eq.s32.totalorder %v486_v41, %v1517_v9 }
  0x3d   : > { %vm730_vm7 = vmor %vm633_vm4, %vm682_vm15  ;;  %vm681_vm15 = vcmp.eq.s32.totalorder %v486_v41, %v1519_v10  ;;  %997 = vperm.xlu2 %1321, %v994_v40  }
  0x3e   : > { %1198 = vmatpush.msk.msra.mxu2 %vm730_vm7, %v1402_v19  ;;  %vm650_vm9 = vmor %vm553_vm2, %vm602_vm8  ;;  %vm552_vm2 = vcmp.eq.s32.totalorder %v503_v42, %v1513_v6  ;;  %vm601_vm8 = vcmp.eq.s32.totalorder %v503_v42, %v1517_v9 }
  0x3f   : > { %vm747_vm12 = vmor %vm650_vm9, %vm699_vm6  ;;  %vm698_vm6 = vcmp.eq.s32.totalorder %v503_v42, %v1519_v10 }
  0x40   : > { %1213 = vmatpush.msk.msra.mxu3 %vm747_vm12, %v1402_v19  ;;  %vm670_vm14 = vmor %vm573_vm11, %vm622_vm13  ;;  %vm572_vm11 = vcmp.eq.s32.totalorder %v523_v43, %v1513_v6  ;;  %vm621_vm13 = vcmp.eq.s32.totalorder %v523_v43, %v1517_v9 }
  0x41   : > { %vm767_vm5 = vmor %vm670_vm14, %vm719_vm10  ;;  %vm718_vm10 = vcmp.eq.s32.totalorder %v523_v43, %v1519_v10 }
  0x42   : > { %1225 = vmatpush.msk.msrb.mxu0 %vm767_vm5, %v1402_v19  ;;  %vm632_vm4 = vmor %vm535_vm1, %vm584_vm3  ;;  %1247 = vmatpush.msk.msrb.mxu1 %vm767_vm5, %v1402_v19  ;;  %vm534_vm1 = vcmp.eq.s32.totalorder %v485_v44, %v1513_v6  ;;  %vm583_vm3 = vcmp.eq.s32.totalorder %v485_v44, %v1517_v9 }
  0x43   : > { %vm729_vm7 = vmor %vm632_vm4, %vm681_vm15  ;;  %vm680_vm15 = vcmp.eq.s32.totalorder %v485_v44, %v1519_v10  ;;  %vm551_vm4 = vcmp.eq.s32.totalorder %v502_v45, %v1513_v6 }
  0x44   : > { %1199 = vmatpush.msk.msra.mxu2 %vm729_vm7, %v1402_v19  ;;  %vm649_vm9 = vmor %vm552_vm2, %vm601_vm8  ;;  %vm600_vm7 = vcmp.eq.s32.totalorder %v502_v45, %v1517_v9  ;;  %vm697_vm8 = vcmp.eq.s32.totalorder %v502_v45, %v1519_v10 }
  0x45   : > { %vm746_vm12 = vmor %vm649_vm9, %vm698_vm6  ;;  %vm571_vm9 = vcmp.eq.s32.totalorder %v522_v46, %v1513_v6 }
  0x46   : > { %1214 = vmatpush.msk.msra.mxu3 %vm746_vm12, %v1402_v19  ;;  %vm669_vm14 = vmor %vm572_vm11, %vm621_vm13  ;;  %vm620_vm11 = vcmp.eq.s32.totalorder %v522_v46, %v1517_v9 }
  0x47   : > { %vm766_vm5 = vmor %vm669_vm14, %vm718_vm10  ;;  %vm717_vm10 = vcmp.eq.s32.totalorder %v522_v46, %v1519_v10  ;;  %vm533_vm14 = vcmp.eq.s32.totalorder %v484_v47, %v1513_v6 }
  0x48   : > { %1226 = vmatpush.msk.msrb.mxu0 %vm766_vm5, %v1402_v19  ;;  %vm631_vm2 = vmor %vm534_vm1, %vm583_vm3  ;;  %1248 = vmatpush.msk.msrb.mxu1 %vm766_vm5, %v1402_v19  ;;  %vm582_vm1 = vcmp.eq.s32.totalorder %v484_v47, %v1517_v9 }
  0x49   : > { %vm728_vm6 = vmor %vm631_vm2, %vm680_vm15  ;;  %vm679_vm15 = vcmp.eq.s32.totalorder %v484_v47, %v1519_v10  ;;  %vm550_vm2 = vcmp.eq.s32.totalorder %v501_v48, %v1513_v6 }
  0x4a   : > { %1200 = vmatpush.msk.msra.mxu2 %vm728_vm6, %v1402_v19  ;;  %vm648_vm13 = vmor %vm551_vm4, %vm600_vm7  ;;  %vm599_vm6 = vcmp.eq.s32.totalorder %v501_v48, %v1517_v9  ;;  %vm696_vm7 = vcmp.eq.s32.totalorder %v501_v48, %v1519_v10 }
  0x4b   : > { %vm745_vm12 = vmor %vm648_vm13, %vm697_vm8  ;;  %vm570_vm13 = vcmp.eq.s32.totalorder %v521_v49, %v1513_v6 }
  0x4c   : > { %1215 = vmatpush.msk.msra.mxu3 %vm745_vm12, %v1402_v19  ;;  %vm668_vm3 = vmor %vm571_vm9, %vm620_vm11  ;;  %vm619_vm12 = vcmp.eq.s32.totalorder %v521_v49, %v1517_v9  ;;  %vm716_vm11 = vcmp.eq.s32.totalorder %v521_v49, %v1519_v10 }
  0x4d   : > { %vm765_vm5 = vmor %vm668_vm3, %vm717_vm10 }
  0x4e   : > { %1227 = vmatpush.msk.msrb.mxu0 %vm765_vm5, %v1402_v19  ;;  %vm630_vm4 = vmor %vm533_vm14, %vm582_vm1  ;;  %1249 = vmatpush.msk.msrb.mxu1 %vm765_vm5, %v1402_v19  ;;  %vm532_vm14 = vcmp.eq.s32.totalorder %v483_v50, %v1513_v6  ;;  %vm581_vm1 = vcmp.eq.s32.totalorder %v483_v50, %v1517_v9  ;;  %vm598_vm5 = vcmp.eq.s32.totalorder %v500_v51, %v1517_v9 }
  0x4f   : > { %vm727_vm8 = vmor %vm630_vm4, %vm679_vm15  ;;  %vm549_vm15 = vcmp.eq.s32.totalorder %v500_v51, %v1513_v6  ;;  %vm695_vm4 = vcmp.eq.s32.totalorder %v500_v51, %v1519_v10 }
  0x50   : > { %1201 = vmatpush.msk.msra.mxu2 %vm727_vm8, %v1402_v19  ;;  %vm647_vm9 = vmor %vm550_vm2, %vm599_vm6  ;;  %vm678_vm6 = vcmp.eq.s32.totalorder %v483_v50, %v1519_v10  ;;  %vm618_vm8 = vcmp.eq.s32.totalorder %v520_v52, %v1517_v9 }
  0x51   : > { %vm744_vm10 = vmor %vm647_vm9, %vm696_vm7  ;;  %vm569_vm7 = vcmp.eq.s32.totalorder %v520_v52, %v1513_v6 }
  0x52   : > { %1216 = vmatpush.msk.msra.mxu3 %vm744_vm10, %v1402_v19  ;;  %vm667_vm3 = vmor %vm570_vm13, %vm619_vm12  ;;  %vm715_vm12 = vcmp.eq.s32.totalorder %v520_v52, %v1519_v10  ;;  %vm580_vm10 = vcmp.eq.s32.totalorder %v482_v53, %v1517_v9 }
  0x53   : > { %vm764_vm0 = vmor %vm667_vm3, %vm716_vm11  ;;  %vm531_vm11 = vcmp.eq.s32.totalorder %v482_v53, %v1513_v6 }
  0x54   : > { %1228 = vmatpush.msk.msrb.mxu0 %vm764_vm0, %v1402_v19  ;;  %1250 = vmatpush.msk.msrb.mxu1 %vm764_vm0, %v1402_v19  ;;  %vm629_vm2 = vmor %vm532_vm14, %vm581_vm1  ;;  %vm677_vm14 = vcmp.eq.s32.totalorder %v482_v53, %v1519_v10 }
  0x55   : > { %vm726_vm0 = vmor %vm629_vm2, %vm678_vm6  ;;  %vm548_vm2 = vcmp.eq.s32.totalorder %v499_v54, %v1513_v6  ;;  %vm597_vm6 = vcmp.eq.s32.totalorder %v499_v54, %v1517_v9 }
  0x56   : > { %1202 = vmatpush.msk.msra.mxu2 %vm726_vm0, %v1402_v19  ;;  %vm646_vm13 = vmor %vm549_vm15, %vm598_vm5  ;;  %vm694_vm5 = vcmp.eq.s32.totalorder %v499_v54, %v1519_v10  ;;  %vm568_vm0 = vcmp.eq.s32.totalorder %v519_v55, %v1513_v6 }
  0x57   : > { %vm743_vm9 = vmor %vm646_vm13, %vm695_vm4  ;;  %vm617_vm13 = vcmp.eq.s32.totalorder %v519_v55, %v1517_v9 }
  0x58   : > { %1217 = vmatpush.msk.msra.mxu3 %vm743_vm9, %v1402_v19  ;;  %vm666_vm3 = vmor %vm569_vm7, %vm618_vm8  ;;  %vm714_vm8 = vcmp.eq.s32.totalorder %v519_v55, %v1519_v10  ;;  %vm530_vm9 = vcmp.eq.s32.totalorder %v481_v56, %v1513_v6 }
  0x59   : > { %vm763_vm1 = vmor %vm666_vm3, %vm715_vm12  ;;  %vm676_vm3 = vcmp.eq.s32.totalorder %v481_v56, %v1519_v10 }
  0x5a   : > { %1229 = vmatpush.msk.msrb.mxu0 %vm763_vm1, %v1402_v19  ;;  %vm628_vm15 = vmor %vm531_vm11, %vm580_vm10  ;;  %1251 = vmatpush.msk.msrb.mxu1 %vm763_vm1, %v1402_v19  ;;  %vm579_vm11 = vcmp.eq.s32.totalorder %v481_v56, %v1517_v9  ;;  %vm547_vm1 = vcmp.eq.s32.totalorder %v498_v57, %v1513_v6 }
  0x5b   : > { %vm725_vm4 = vmor %vm628_vm15, %vm677_vm14  ;;  %vm596_vm15 = vcmp.eq.s32.totalorder %v498_v57, %v1517_v9 }
  0x5c   : > { %1203 = vmatpush.msk.msra.mxu2 %vm725_vm4, %v1402_v19  ;;  %vm645_vm7 = vmor %vm548_vm2, %vm597_vm6  ;;  %vm693_vm6 = vcmp.eq.s32.totalorder %v498_v57, %v1519_v10 }
  0x5d   : > { %vm742_vm12 = vmor %vm645_vm7, %vm694_vm5  ;;  %vm470_vm5 = vcmask 39936  }
  0x5e   : > { %1218 = vmatpush.msk.msra.mxu3 %vm742_vm12, %v1402_v19  ;;  %vm665_vm10 = vmor %vm568_vm0, %vm617_vm13  ;;  %vm567_vm0 = vcmp.eq.s32.totalorder %v518_v58, %v1513_v6  ;;  %vm616_vm13 = vcmp.eq.s32.totalorder %v518_v58, %v1517_v9  ;;  %471 = vst.msk [vmem:[#allocation2 + $0x10] sm:$0xff] %vm470_vm5, %v466_v60 }
  0x5f   : > { %vm762_vm14 = vmor %vm665_vm10, %vm714_vm8  ;;  %vm713_vm8 = vcmp.eq.s32.totalorder %v518_v58, %v1519_v10  ;;  %472 = vst.msk [vmem:[#allocation2 + $0x28] sm:$0xff] %vm470_vm5, %v467_v2 }
  0x60   : > { %1230 = vmatpush.msk.msrb.mxu0 %vm762_vm14, %v1402_v19  ;;  %vm627_vm2 = vmor %vm530_vm9, %vm579_vm11  ;;  %1252 = vmatpush.msk.msrb.mxu1 %vm762_vm14, %v1402_v19  ;;  %vm529_vm9 = vcmp.eq.s32.totalorder %v480_v59, %v1513_v6  ;;  %vm578_vm11 = vcmp.eq.s32.totalorder %v480_v59, %v1517_v9  ;;  %473 = vst.msk [vmem:[#allocation2 + $0x40] sm:$0xff] %vm470_vm5, %v468_v12 }
  0x61   : > { %vm724_vm4 = vmor %vm627_vm2, %vm676_vm3  ;;  %vm675_vm3 = vcmp.eq.s32.totalorder %v480_v59, %v1519_v10  ;;  %vm546_vm2 = vcmp.eq.s32.totalorder %v497_v61, %v1513_v6  ;;  %474 = vst.msk [vmem:[#allocation2 + $0x58] sm:$0xff] %vm470_vm5, %v469_v18  ;;  %vm1933_vm5 = vcmask 261120  }
  0x62   : > { %1204 = vmatpush.msk.msra.mxu2 %vm724_vm4, %v1402_v19  ;;  %vm644_vm7 = vmor %vm547_vm1, %vm596_vm15  ;;  %vm595_vm4 = vcmp.eq.s32.totalorder %v497_v61, %v1517_v9  ;;  %vm692_vm15 = vcmp.eq.s32.totalorder %v497_v61, %v1519_v10 }
  0x63   : > { %vm741_vm12 = vmor %vm644_vm7, %vm693_vm6  ;;  %vm566_vm7 = vcmp.eq.s32.totalorder %v517_v62, %v1513_v6 }
  0x64   : > { %1219 = vmatpush.msk.msra.mxu3 %vm741_vm12, %v1402_v19  ;;  %vm664_vm10 = vmor %vm567_vm0, %vm616_vm13  ;;  %vm615_vm12 = vcmp.eq.s32.totalorder %v517_v62, %v1517_v9  ;;  %vm712_vm13 = vcmp.eq.s32.totalorder %v517_v62, %v1519_v10 }
  0x65   : > { %vm761_vm14 = vmor %vm664_vm10, %vm713_vm8 }
  0x66   : > { %1231 = vmatpush.msk.msrb.mxu0 %vm761_vm14, %v1402_v19  ;;  %vm626_vm1 = vmor %vm529_vm9, %vm578_vm11  ;;  %1253 = vmatpush.msk.msrb.mxu1 %vm761_vm14, %v1402_v19  ;;  %vm528_vm9 = vcmp.eq.s32.totalorder %v1515_v8, %v1513_v6  ;;  %vm577_vm11 = vcmp.eq.s32.totalorder %v1515_v8, %v1517_v9  ;;  %v871_v24 = vld [vmem:[#allocation2 + $0x28] sm:$0xff] }
  0x67   : > { %vm723_vm6 = vmor %vm626_vm1, %vm675_vm3  ;;  %vm674_vm3 = vcmp.eq.s32.totalorder %v1515_v8, %v1519_v10  ;;  %v881_v8 = vld [vmem:[%s1924_s5 + $0x18] sm:$0xff]  ;;  %v874_v29 = vld [vmem:[#allocation2 + $0x40] sm:$0xff] }
  0x68   : > { %1205 = vmatpush.msk.msra.mxu2 %vm723_vm6, %v1402_v19  ;;  %vm643_vm0 = vmor %vm546_vm2, %vm595_vm4  ;;  %vm545_vm2 = vcmp.eq.s32.totalorder %v496_v63, %v1513_v6  ;;  %vm594_vm4 = vcmp.eq.s32.totalorder %v496_v63, %v1517_v9  ;;  %899 = vperm.xlu0 %1319, %v881_v8   ;;  %v877_v23 = vld [vmem:[#allocation2 + $0x58] sm:$0xff] }
  0x69   : > { %vm740_vm8 = vmor %vm643_vm0, %vm692_vm15  ;;  %vm691_vm15 = vcmp.eq.s32.totalorder %v496_v63, %v1519_v10 }
  0x6a   : > { %1220 = vmatpush.msk.msra.mxu3 %vm740_vm8, %v1402_v19  ;;  %vm663_vm10 = vmor %vm566_vm7, %vm615_vm12  ;;  %vm565_vm7 = vcmp.eq.s32.totalorder %v516_v3, %v1513_v6  ;;  %vm614_vm12 = vcmp.eq.s32.totalorder %v516_v3, %v1517_v9 }
  0x6b   : > { %vm760_vm14 = vmor %vm663_vm10, %vm712_vm13  ;;  %vm711_vm13 = vcmp.eq.s32.totalorder %v516_v3, %v1519_v10  ;;  %vm544_vm10 = vcmp.eq.s32.totalorder %v495_v4, %v1513_v6 }
  0x6c   : > { %1232 = vmatpush.msk.msrb.mxu0 %vm760_vm14, %v1402_v19  ;;  %vm625_vm1 = vmor %vm528_vm9, %vm577_vm11  ;;  %1254 = vmatpush.msk.msrb.mxu1 %vm760_vm14, %v1402_v19  ;;  %vm593_vm9 = vcmp.eq.s32.totalorder %v495_v4, %v1517_v9 }
  0x6d   : > { %vm722_vm6 = vmor %vm625_vm1, %vm674_vm3  ;;  %vm690_vm3 = vcmp.eq.s32.totalorder %v495_v4, %v1519_v10  ;;  %v993_v4 = vld [vmem:[%s1925_s6] sm:$0xff] }
  0x6e   : > { %1206 = vmatpush.msk.msra.mxu2 %vm722_vm6, %v1402_v19  ;;  %vm642_vm0 = vmor %vm545_vm2, %vm594_vm4  ;;  %vm564_vm2 = vcmp.eq.s32.totalorder %v515_v5, %v1513_v6  ;;  %vm613_vm4 = vcmp.eq.s32.totalorder %v515_v5, %v1517_v9 }
  0x6f   : > { %vm739_vm8 = vmor %vm642_vm0, %vm691_vm15  ;;  %vm710_vm15 = vcmp.eq.s32.totalorder %v515_v5, %v1519_v10  ;;  %vm412_vm0 = vcmask 130048  }
  0x70   : > { %1221 = vmatpush.msk.msra.mxu3 %vm739_vm8, %v1402_v19  ;;  %vm662_vm11 = vmor %vm565_vm7, %vm614_vm12  ;;  %vm563_vm7 = vcmp.eq.s32.totalorder %v514_v7, %v1513_v6  ;;  %vm612_vm12 = vcmp.eq.s32.totalorder %v514_v7, %v1517_v9  ;;  %vm709_vm8 = vcmp.eq.s32.totalorder %v514_v7, %v1519_v10 }
  0x71   : > { %vm759_vm14 = vmor %vm662_vm11, %vm711_vm13 }
  0x72   : > { %1233 = vmatpush.msk.msrb.mxu0 %vm759_vm14, %v1402_v19  ;;  %vm641_vm1 = vmor %vm544_vm10, %vm593_vm9  ;;  %1255 = vmatpush.msk.msrb.mxu1 %vm759_vm14, %v1402_v19  ;;  %vm562_vm10 = vcmp.eq.s32.totalorder %v513_v13, %v1513_v6  ;;  %vm611_vm9 = vcmp.eq.s32.totalorder %v513_v13, %v1517_v9  ;;  %vm708_vm14 = vcmp.eq.s32.totalorder %v513_v13, %v1519_v10 }
  0x73   : > { %vm738_vm6 = vmor %vm641_vm1, %vm690_vm3  ;;  %vm610_vm1 = vcmp.eq.s32.totalorder %v512_v14, %v1517_v9 }
  0x74   : > { %1222 = vmatpush.msk.msra.mxu3 %vm738_vm6, %v1402_v19  ;;  %vm661_vm13 = vmor %vm564_vm2, %vm613_vm4  ;;  %vm561_vm4 = vcmp.eq.s32.totalorder %v512_v14, %v1513_v6  ;;  %vm707_vm6 = vcmp.eq.s32.totalorder %v512_v14, %v1519_v10 }
  0x75   : > { %vm758_vm11 = vmor %vm661_vm13, %vm710_vm15  ;;  %vm609_vm13 = vcmp.eq.s32.totalorder %v511_v15, %v1517_v9  ;;  %v880_v9 = vld [vmem:[%s1924_s5 + $0x10] sm:$0xff] }
  0x76   : > { %1234 = vmatpush.msk.msrb.mxu0 %vm758_vm11, %v1402_v19  ;;  %vm660_vm3 = vmor %vm563_vm7, %vm612_vm12  ;;  %1256 = vmatpush.msk.msrb.mxu1 %vm758_vm11, %v1402_v19  ;;  %vm560_vm12 = vcmp.eq.s32.totalorder %v511_v15, %v1513_v6  ;;  %vm706_vm11 = vcmp.eq.s32.totalorder %v511_v15, %v1519_v10  ;;  %v868_v6 = vld [vmem:[#allocation2 + $0x10] sm:$0xff] }
  0x77   : > { %vm757_vm2 = vmor %vm660_vm3, %vm709_vm8  ;;  %894 = vperm.xlu0 %1319, %v880_v9  }
  0x78   : > { %1235 = vmatpush.msk.msrb.mxu0 %vm757_vm2, %v1402_v19  ;;  %vm659_vm15 = vmor %vm562_vm10, %vm611_vm9  ;;  %1257 = vmatpush.msk.msrb.mxu1 %vm757_vm2, %v1402_v19 }
  0x79   : > { %vm756_vm7 = vmor %vm659_vm15, %vm708_vm14 }
  0x7a   : > { %1236 = vmatpush.msk.msrb.mxu0 %vm756_vm7, %v1402_v19  ;;  %vm658_vm8 = vmor %vm561_vm4, %vm610_vm1  ;;  %1258 = vmatpush.msk.msrb.mxu1 %vm756_vm7, %v1402_v19 }
  0x7b   : > { %vm755_vm10 = vmor %vm658_vm8, %vm707_vm6 }
  0x7c   : > { %1237 = vmatpush.msk.msrb.mxu0 %vm755_vm10, %v1402_v19  ;;  %vm657_vm9 = vmor %vm560_vm12, %vm609_vm13  ;;  %1259 = vmatpush.msk.msrb.mxu1 %vm755_vm10, %v1402_v19 }
  0x7d   : > { %vm754_vm3 = vmor %vm657_vm9, %vm706_vm11 }
  0x7e   : > { %1238 = vmatpush.msk.msrb.mxu0 %vm754_vm3, %v1402_v19  ;;  %1260 = vmatpush.msk.msrb.mxu1 %vm754_vm3, %v1402_v19 }
  0x7f   : > { %976 = vmatmul.f32.vlgmr.msrb.gmra.mxu0 %v868_v6  ;;  %985 = vmatmul.f32.vlgmr.msrb.gmra.mxu1 %v877_v23 }
  0x87   : > { %979 = vmatmul.f32.gmra.mxu0 %v871_v24 }
  0x8f   : > { %982 = vmatmul.f32.gmra.mxu0 %v874_v29 }
  0x97   : > { %v998_v5 = vpop.permute.xlu2 %997 }
  0x9d   : > { %v400_v16 = vpop.f32.mrf.mxu0  ;;  %v450_v17 = vpop.f32.mrf.mxu1 }
  0x9e   : > { %413 = vst.msk [vmem:[#allocation2] sm:$0xff] %vm412_vm0, %v400_v16 }
  0x9f   : > { %462 = vst.msk [vmem:[#allocation2 + $0x8] sm:$0xff] %vm412_vm0, %v450_v17  ;;  %v890_v42 = vpop.permute.xlu1 %889 }
  0xa5   : > { %v403_v20 = vpop.f32.mrf.mxu0  ;;  %v866_v21 = vld [vmem:[#allocation2] sm:$0xff]  ;;  %v453_v22 = vpop.f32.mrf.mxu1 }
  0xa6   : > { %414 = vst.msk [vmem:[#allocation2 + $0x18] sm:$0xff] %vm412_vm0, %v403_v20  ;;  %918 = vmatmul.f32.vlgmr.msra.gmra.mxu2 %v866_v21  ;;  %v867_v10 = vld [vmem:[#allocation2 + $0x8] sm:$0xff] }
  0xa7   : > { %463 = vst.msk [vmem:[#allocation2 + $0x20] sm:$0xff] %vm412_vm0, %v453_v22  ;;  %947 = vmatmul.f32.vlgmr.msra.gmra.mxu3 %v867_v10  ;;  %v885_v48 = vpop.permute.xlu1 %884 }
  0xad   : > { %v406_v25 = vpop.f32.mrf.mxu0  ;;  %v869_v26 = vld [vmem:[#allocation2 + $0x18] sm:$0xff]  ;;  %v456_v27 = vpop.f32.mrf.mxu1 }
  0xae   : > { %415 = vst.msk [vmem:[#allocation2 + $0x30] sm:$0xff] %vm412_vm0, %v406_v25  ;;  %921 = vmatmul.f32.gmra.mxu2 %v869_v26  ;;  %v870_v28 = vld [vmem:[#allocation2 + $0x20] sm:$0xff] }
  0xaf   : > { %464 = vst.msk [vmem:[#allocation2 + $0x38] sm:$0xff] %vm412_vm0, %v456_v27  ;;  %950 = vmatmul.f32.gmra.mxu3 %v870_v28 }
  0xb5   : > { %v409_v30 = vpop.f32.mrf.mxu0  ;;  %v872_v31 = vld [vmem:[#allocation2 + $0x30] sm:$0xff]  ;;  %v459_v32 = vpop.f32.mrf.mxu1 }
  0xb6   : > { %416 = vst.msk [vmem:[#allocation2 + $0x48] sm:$0xff] %vm412_vm0, %v409_v30  ;;  %924 = vmatmul.f32.gmra.mxu2 %v872_v31  ;;  %v873_v19 = vld [vmem:[#allocation2 + $0x38] sm:$0xff] }
  0xb7   : > { %465 = vst.msk [vmem:[#allocation2 + $0x50] sm:$0xff] %vm412_vm0, %v459_v32  ;;  %953 = vmatmul.f32.gmra.mxu3 %v873_v19  ;;  %vm1024_vm0 = vcmask 64512  }
  0xbd   : > { %v875_v33 = vld [vmem:[#allocation2 + $0x48] sm:$0xff] }
  0xbe   : > { %927 = vmatmul.f32.gmra.mxu2 %v875_v33  ;;  %v876_v34 = vld [vmem:[#allocation2 + $0x50] sm:$0xff] }
  0xbf   : > { %956 = vmatmul.f32.gmra.mxu3 %v876_v34 }
  0xda   : > { %v900_v38 = vpop.permute.xlu0 %899 }
  0xe9   : > { %v895_v46 = vpop.permute.xlu0 %894 }
  0xfc   : > { %v977_v37 = vpop.f32.mrf.mxu0  ;;  %v986_v56 = vpop.f32.mrf.mxu1 }
 0x104   : > { %v980_v43 = vpop.f32.mrf.mxu0 }
 0x10c   : > { %v983_v55 = vpop.f32.mrf.mxu0 }
 0x129   : > { %v919_v35 = vpop.f32.mrf.mxu2 }
 0x12a   : > { %v948_v36 = vpop.f32.mrf.mxu3  ;;  %v920_v51 = vadd.f32 %v919_v35, %v885_v48 }
 0x12c   : > { %v949_v59 = vadd.f32 %v948_v36, %v920_v51 }
 0x12e   : > { %v978_v0 = vadd.f32 %v977_v37, %v949_v59 }
 0x130   : > { %v989_v3 = vmax.f32 %v978_v0, 0.0 }
 0x131   : > { %v922_v39 = vpop.f32.mrf.mxu2 }
 0x132   : > { %v951_v41 = vpop.f32.mrf.mxu3  ;;  %v923_v49 = vadd.f32 %v922_v39, %v890_v42 }
 0x134   : > { %v952_v57 = vadd.f32 %v951_v41, %v923_v49 }
 0x136   : > { %v981_v62 = vadd.f32 %v980_v43, %v952_v57 }
 0x138   : > { %v990_v2 = vmax.f32 %v981_v62, 0.0 }
 0x139   : > { %v925_v44 = vpop.f32.mrf.mxu2 }
 0x13a   : > { %v954_v45 = vpop.f32.mrf.mxu3  ;;  %v926_v47 = vadd.f32 %v925_v44, %v895_v46 }
 0x13c   : > { %v955_v52 = vadd.f32 %v954_v45, %v926_v47 }
 0x13e   : > { %v984_v60 = vadd.f32 %v983_v55, %v955_v52 }
 0x140   : > { %v991_v1 = vmax.f32 %v984_v60, 0.0 }
 0x141   : > { %v928_v50 = vpop.f32.mrf.mxu2 }
 0x142   : > { %v929_v53 = vadd.f32 %v928_v50, %v900_v38  ;;  %v957_v54 = vpop.f32.mrf.mxu3 }
 0x144   : > { %v958_v58 = vadd.f32 %v957_v54, %v929_v53 }
 0x146   : > { %v987_v61 = vadd.f32 %v986_v56, %v958_v58 }
 0x148   : > { %v992_v63 = vmax.f32 %v987_v61, 0.0 }
 0x14a   : > { %1016 = vmatpush.msra.mxu1 %v992_v63 }
 0x14c   : > { %1017 = vmatpush.msra.mxu1 %v991_v1 }
 0x14e   : > { %1018 = vmatpush.msra.mxu1 %v990_v2 }
 0x150   : > { %1019 = vmatpush.msra.mxu1 %v989_v3 }
 0x151   : > { %1239 = vmatmul.msk.f32.vlgmr.msra.gmra.mxu1 %vm1933_vm5, %v993_v4 }
 0x1ce   : > { %v1021_v7 = vpop.f32.mrf.mxu1 }
 0x1cf   : > { %v1022_v11 = vadd.f32 %v1021_v7, %v998_v5 }
 0x1d1   : > { %1025 = vst.msk [vmem:[%s333_s22] sm:$0xff] %vm1024_vm0, %v1022_v11 }
 0x1d2   : > { %1349 = shalt.err (!%p1346_p5)
}
 0x1d3   : > { %1261 = dma.vmem_to_hbm [thread:$0]  (%p1490_p4), %s1041_s23, 128, %s1043_s24, %s1027_s25  }
 0x1d4 PF: > { %p1267_p6 = scmp.ge.s32.totalorder %s1400_s10, 2  ;;  %s1054_s12 = sand.u32 1, %s1380_s27  }
 0x1d5   : > { %s1055_s21 = scalar_lea.sflag [#allocation4], %s1054_s12 }
 0x1d6   : > { %p1264_p7 = pnand %p1267_p6, %p1497_p8 }
 0x1d8   : > { %p1265_p9 = pneg %p1264_p7 }
 0x1da   : > { %1375 = dma.done.wait (%p1265_p9), %s1055_s21, 128  }
 0x1db   : > { %1377 = vsyncadd (%p1265_p9), %s1055_s21, 4294967168  ;;  %s21_s10 = sadd.s32 1, %s1400_s10   ;;  %s1934_s27 = smov %s1384_s28 }
 0x1dc   : > { %p18_p10 = scmp.ge.s32.totalorder %s21_s10, 4   ;;  %s1935_s28 = smov %s1388_s29 }
 0x1dd   : > { %s1936_s29 = smov %s1503_s18  ;;  %s1937_s30 = smov %s1396_s9 }
 0x1de   : > { %s1938_s9 = smov %s1940_s13  ;;  %20 = sbr.rel (!%p18_p10) target bundleno = 4 (0x4), region = 94 }
 0x1e3   :  { %1061 = vsyncpa [#allocation4], 1 }
 0x1e4   :  { %1063 = vsyncpa [#allocation4 + $0x1], 1 }

</bundles_post_ra>
